<compile_context>
chip_gen: v5e
topology: v5e:2x2
jax: 0.10.0
libtpu: 0.0.40
codegen_flags: <defaults>
</compile_context>

<pallas_src>
import jax
import jax.numpy as jnp
from jax.experimental import pallas as pl
from jax.experimental.pallas import tpu as pltpu


_LIN_PAD = 224  # 220 rounded up to a multiple of 8 (f32 sublane tile)


def _round_up(v, m):
    return (v + m - 1) // m * m


def _leaky(x):
    # identical to jnp.where(x > 0, x, 0.01 * x) for slope < 1, one fewer VALU op
    return jnp.maximum(x, 0.01 * x)


def discriminator_kernel(x_ref,
                         w1_ref, b1_ref,
                         w2_ref, b2_ref,
                         w3_ref, b3_ref,
                         l1w_ref, l1b_ref,
                         l2w_ref, l2b_ref,
                         l3w_ref, l3b_ref,
                         out_ref):
    # Activations are (C, N_tile); batch fills the 128 lanes.
    h = x_ref[...]                                                          # (4,   Nt) f32

    # conv_1 / conv_2 / conv_3 (center tap only, since L == 1) + LeakyReLU(0.01)
    h = _leaky(jnp.dot(w1_ref[...], h,
                       preferred_element_type=jnp.float32) + b1_ref[...])   # (32,  Nt)
    h = _leaky(jnp.dot(w2_ref[...], h,
                       preferred_element_type=jnp.float32) + b2_ref[...])   # (64,  Nt)
    h = _leaky(jnp.dot(w3_ref[...], h,
                       preferred_element_type=jnp.float32) + b3_ref[...])   # (128, Nt)

    # linear_1 + LeakyReLU   (bf16 operands, f32 accumulation; pad rows stay 0)
    h = _leaky(jnp.dot(l1w_ref[...], h.astype(jnp.bfloat16),
                       preferred_element_type=jnp.float32) + l1b_ref[...])  # (224, Nt)
    # linear_2 + ReLU
    h = jnp.maximum(jnp.dot(l2w_ref[...], h.astype(jnp.bfloat16),
                            preferred_element_type=jnp.float32) + l2b_ref[...], 0.0)
    # linear_3 + Sigmoid  (lane-dense (1, Nt) result)
    z = jnp.dot(l3w_ref[...], h.astype(jnp.bfloat16),
                preferred_element_type=jnp.float32) + l3b_ref[...]          # (1,   Nt)
    out_ref[...] = pl.reciprocal(1.0 + jnp.exp(-z), approx=True)


def init_params(key):
    """Deterministic PyTorch-default-style init (uniform +-1/sqrt(fan_in))."""
    ks = jax.random.split(key, 12)

    def u(k, shape, fan_in):
        bound = 1.0 / jnp.sqrt(float(fan_in))
        return jax.random.uniform(k, shape, jnp.float32, -bound, bound)

    return dict(
        conv1_w=u(ks[0], (32, 4, 5), 4 * 5),    conv1_b=u(ks[1], (32,), 4 * 5),
        conv2_w=u(ks[2], (64, 32, 5), 32 * 5),  conv2_b=u(ks[3], (64,), 32 * 5),
        conv3_w=u(ks[4], (128, 64, 3), 64 * 3), conv3_b=u(ks[5], (128,), 64 * 3),
        lin1_w=u(ks[6], (220, 128), 128),       lin1_b=u(ks[7], (220,), 128),
        lin2_w=u(ks[8], (220, 220), 220),       lin2_b=u(ks[9], (220,), 220),
        lin3_w=u(ks[10], (1, 220), 220),        lin3_b=u(ks[11], (1,), 220),
    )


def discriminator_forward(x, params, block_n=2048):
    """x: (N, 4, 1) float32 (NCL; L must be 1 to match the module's reshape)."""
    N, C, L = x.shape
    assert C == 4 and L == 1, "module's reshape requires L == 1"

    # ---- grid / tile selection ----
    # >= 2 (and even) grid steps so both v7x TensorCores get work; tile derived
    # from cdiv(N, g) so per-tile batch padding is bounded to < 128 lanes.
    g = max(pl.cdiv(N, block_n), 2)
    if g % 2:
        g += 1
    tile = _round_up(pl.cdiv(N, g), 128)   # lanes per grid step (multiple of 128)
    n_pad = g * tile

    # ---- host-side layout prep (feature-major, padded) ----
    x_fm = x[:, :, 0].T                                      # (4, N), batch -> lanes
    x_fm = jnp.pad(x_fm, ((0, 0), (0, n_pad - N)))           # zero-pad batch

    # Conv 'same' with L==1 ==> only the center tap ever touches real data.
    w1 = params["conv1_w"][:, :, 2]                          # (32, 4)   (C_out, C_in)
    w2 = params["conv2_w"][:, :, 2]                          # (64, 32)
    w3 = params["conv3_w"][:, :, 1]                          # (128, 64)

    p = _LIN_PAD - 220
    # Linear weights: zero-pad 220 -> 224 and cast to bf16 (f32 accumulation in-kernel).
    l1w = jnp.pad(params["lin1_w"], ((0, p), (0, 0))).astype(jnp.bfloat16)  # (224, 128)
    l2w = jnp.pad(params["lin2_w"], ((0, p), (0, p))).astype(jnp.bfloat16)  # (224, 224)
    l3w = jnp.pad(params["lin3_w"], ((0, 0), (0, p))).astype(jnp.bfloat16)  # (1,   224)

    b1 = params["conv1_b"].reshape(-1, 1)                    # (32, 1)
    b2 = params["conv2_b"].reshape(-1, 1)                    # (64, 1)
    b3 = params["conv3_b"].reshape(-1, 1)                    # (128, 1)
    l1b = jnp.pad(params["lin1_b"], (0, p)).reshape(-1, 1)   # (224, 1)
    l2b = jnp.pad(params["lin2_b"], (0, p)).reshape(-1, 1)   # (224, 1)
    l3b = params["lin3_b"].reshape(-1, 1)                    # (1, 1)

    args = (x_fm, w1, b1, w2, b2, w3, b3, l1w, l1b, l2w, l2b, l3w, l3b)

    # Weights/biases: constant index_map -> resident in VMEM across the grid.
    const_spec = lambda a: pl.BlockSpec(a.shape, lambda i: (0, 0))
    in_specs = ([pl.BlockSpec((4, tile), lambda i: (0, i))]
                + [const_spec(a) for a in args[1:]])
    out_specs = pl.BlockSpec((1, tile), lambda i: (0, i))

    flops_per_row = 2 * (4 * 32 + 32 * 64 + 64 * 128 + 128 * 220 + 220 * 220 + 220 * 1)
    weight_bytes = sum(int(a.size) * a.dtype.itemsize for a in args[1:])
    cost = pl.CostEstimate(
        flops=flops_per_row * n_pad,
        transcendentals=2 * n_pad,                           # exp + reciprocal
        bytes_accessed=n_pad * (4 + 1) * 4 + weight_bytes,
    )

    out = pl.pallas_call(
        discriminator_kernel,
        out_shape=jax.ShapeDtypeStruct((1, n_pad), jnp.float32),
        grid=(g,),
        in_specs=in_specs,
        out_specs=out_specs,
        compiler_params=pltpu.CompilerParams(
            dimension_semantics=("parallel",)),               # 2 TCs on v7x
        cost_estimate=cost,
    )(*args)

    return out[:, :N].T                                       # (N, 1)


def reference_forward(x, params):
    """Pure-JAX f32 reference matching the PyTorch module op-for-op."""
    leaky = lambda v: jnp.where(v > 0, v, 0.01 * v)

    def conv_same(h, w, b):
        out = jax.lax.conv_general_dilated(
            h, w, window_strides=(1,), padding="SAME",
            dimension_numbers=("NCH", "OIH", "NCH"))
        return out + b[None, :, None]

    h = leaky(conv_same(x, params["conv1_w"], params["conv1_b"]))
    h = leaky(conv_same(h, params["conv2_w"], params["conv2_b"]))
    h = leaky(conv_same(h, params["conv3_w"], params["conv3_b"]))
    h = h.reshape(h.shape[0], h.shape[1])
    h = leaky(h @ params["lin1_w"].T + params["lin1_b"])
    h = jnp.maximum(h @ params["lin2_w"].T + params["lin2_b"], 0.0)
    z = h @ params["lin3_w"].T + params["lin3_b"]
    return jax.nn.sigmoid(z)


if __name__ == "__main__":
    key = jax.random.PRNGKey(0)
    k_param, k_x = jax.random.split(key)
    params = init_params(k_param)

    # batch=2, channels=4, length=1 (length forced to 1 by the module's reshape)
    x = jax.random.normal(k_x, (2, 4, 1), dtype=jnp.float32)

    out = discriminator_forward(x, params)
    out = jax.block_until_ready(out)

    ref = jax.block_until_ready(reference_forward(x, params))
    assert out.shape == (2, 1)
    # tolerance covers bf16 linear layers + EUP approximate-reciprocal sigmoid
    assert jnp.allclose(out, ref, atol=2e-3, rtol=2e-3), (out, ref)

    print("KERNEL_OK")
</pallas_src>

<mosaic_0001>
module attributes {stable_mosaic.version = 11 : i64} {
  func.func @discriminator_kernel(%arg0: i32, %arg1: memref<4x128xf32, #tpu.memory_space<vmem>>, %arg2: memref<32x4xf32, #tpu.memory_space<vmem>>, %arg3: memref<32x1xf32, #tpu.memory_space<vmem>>, %arg4: memref<64x32xf32, #tpu.memory_space<vmem>>, %arg5: memref<64x1xf32, #tpu.memory_space<vmem>>, %arg6: memref<128x64xf32, #tpu.memory_space<vmem>>, %arg7: memref<128x1xf32, #tpu.memory_space<vmem>>, %arg8: memref<224x128xbf16, #tpu.memory_space<vmem>>, %arg9: memref<224x1xf32, #tpu.memory_space<vmem>>, %arg10: memref<224x224xbf16, #tpu.memory_space<vmem>>, %arg11: memref<224x1xf32, #tpu.memory_space<vmem>>, %arg12: memref<1x224xbf16, #tpu.memory_space<vmem>>, %arg13: memref<1x1xf32, #tpu.memory_space<vmem>>, %arg14: memref<1x128xf32, #tpu.memory_space<vmem>>) attributes {dimension_semantics = [#tpu.dimension_semantics<parallel>], iteration_bounds = array<i64: 2>, scalar_prefetch = 0 : i64, scratch_operands = 0 : i64, tpu.core_type = #tpu.core_type<tc>, window_params = [{transform_indices = @transform_0, window_bounds = array<i64: 4, 128>}, {pipeline_mode = #tpu.pipeline_mode<synchronous>, transform_indices = @transform_1, window_bounds = array<i64: 32, 4>}, {pipeline_mode = #tpu.pipeline_mode<synchronous>, transform_indices = @transform_2, window_bounds = array<i64: 32, 1>}, {pipeline_mode = #tpu.pipeline_mode<synchronous>, transform_indices = @transform_3, window_bounds = array<i64: 64, 32>}, {pipeline_mode = #tpu.pipeline_mode<synchronous>, transform_indices = @transform_4, window_bounds = array<i64: 64, 1>}, {pipeline_mode = #tpu.pipeline_mode<synchronous>, transform_indices = @transform_5, window_bounds = array<i64: 128, 64>}, {pipeline_mode = #tpu.pipeline_mode<synchronous>, transform_indices = @transform_6, window_bounds = array<i64: 128, 1>}, {pipeline_mode = #tpu.pipeline_mode<synchronous>, transform_indices = @transform_7, window_bounds = array<i64: 224, 128>}, {pipeline_mode = #tpu.pipeline_mode<synchronous>, transform_indices = @transform_8, window_bounds = array<i64: 224, 1>}, {pipeline_mode = #tpu.pipeline_mode<synchronous>, transform_indices = @transform_9, window_bounds = array<i64: 224, 224>}, {pipeline_mode = #tpu.pipeline_mode<synchronous>, transform_indices = @transform_10, window_bounds = array<i64: 224, 1>}, {pipeline_mode = #tpu.pipeline_mode<synchronous>, transform_indices = @transform_11, window_bounds = array<i64: 1, 224>}, {pipeline_mode = #tpu.pipeline_mode<synchronous>, transform_indices = @transform_12, window_bounds = array<i64: 1, 1>}, {transform_indices = @transform_13, window_bounds = array<i64: 1, 128>}]} {
    %c0 = arith.constant 0 : index
    %c0_0 = arith.constant 0 : index
    %0 = vector.load %arg1[%c0, %c0_0] : memref<4x128xf32, #tpu.memory_space<vmem>>, vector<4x128xf32>
    %c0_1 = arith.constant 0 : index
    %c0_2 = arith.constant 0 : index
    %1 = vector.load %arg2[%c0_1, %c0_2] : memref<32x4xf32, #tpu.memory_space<vmem>>, vector<32x4xf32>
    %cst = arith.constant dense<0.000000e+00> : vector<32x128xf32>
    %2 = tpu.matmul %1, %0, %cst {dimension_numbers = #tpu.dot_dimension_numbers<[1], [0], [0], [1], [0, 0, 1, 1], [], []>} : vector<32x4xf32>, vector<4x128xf32>, vector<32x128xf32> -> vector<32x128xf32>
    %c0_3 = arith.constant 0 : index
    %c0_4 = arith.constant 0 : index
    %3 = vector.load %arg3[%c0_3, %c0_4] : memref<32x1xf32, #tpu.memory_space<vmem>>, vector<32x1xf32>
    %4 = vector.broadcast %3 : vector<32x1xf32> to vector<32x128xf32>
    %5 = arith.addf %2, %4 : vector<32x128xf32>
    %cst_5 = arith.constant 0.00999999977 : f32
    %6 = vector.broadcast %cst_5 : f32 to vector<32x128xf32>
    %7 = arith.mulf %6, %5 : vector<32x128xf32>
    %8 = arith.maximumf %5, %7 : vector<32x128xf32>
    %c0_6 = arith.constant 0 : index
    %c0_7 = arith.constant 0 : index
    %9 = vector.load %arg4[%c0_6, %c0_7] : memref<64x32xf32, #tpu.memory_space<vmem>>, vector<64x32xf32>
    %cst_8 = arith.constant dense<0.000000e+00> : vector<64x128xf32>
    %10 = tpu.matmul %9, %8, %cst_8 {dimension_numbers = #tpu.dot_dimension_numbers<[1], [0], [0], [1], [0, 0, 1, 1], [], []>} : vector<64x32xf32>, vector<32x128xf32>, vector<64x128xf32> -> vector<64x128xf32>
    %c0_9 = arith.constant 0 : index
    %c0_10 = arith.constant 0 : index
    %11 = vector.load %arg5[%c0_9, %c0_10] : memref<64x1xf32, #tpu.memory_space<vmem>>, vector<64x1xf32>
    %12 = vector.broadcast %11 : vector<64x1xf32> to vector<64x128xf32>
    %13 = arith.addf %10, %12 : vector<64x128xf32>
    %cst_11 = arith.constant 0.00999999977 : f32
    %14 = vector.broadcast %cst_11 : f32 to vector<64x128xf32>
    %15 = arith.mulf %14, %13 : vector<64x128xf32>
    %16 = arith.maximumf %13, %15 : vector<64x128xf32>
    %c0_12 = arith.constant 0 : index
    %c0_13 = arith.constant 0 : index
    %17 = vector.load %arg6[%c0_12, %c0_13] : memref<128x64xf32, #tpu.memory_space<vmem>>, vector<128x64xf32>
    %cst_14 = arith.constant dense<0.000000e+00> : vector<128x128xf32>
    %18 = tpu.matmul %17, %16, %cst_14 {dimension_numbers = #tpu.dot_dimension_numbers<[1], [0], [0], [1], [0, 0, 1, 1], [], []>} : vector<128x64xf32>, vector<64x128xf32>, vector<128x128xf32> -> vector<128x128xf32>
    %c0_15 = arith.constant 0 : index
    %c0_16 = arith.constant 0 : index
    %19 = vector.load %arg7[%c0_15, %c0_16] : memref<128x1xf32, #tpu.memory_space<vmem>>, vector<128x1xf32>
    %20 = vector.broadcast %19 : vector<128x1xf32> to vector<128x128xf32>
    %21 = arith.addf %18, %20 : vector<128x128xf32>
    %cst_17 = arith.constant 0.00999999977 : f32
    %22 = vector.broadcast %cst_17 : f32 to vector<128x128xf32>
    %23 = arith.mulf %22, %21 : vector<128x128xf32>
    %24 = arith.maximumf %21, %23 : vector<128x128xf32>
    %c0_18 = arith.constant 0 : index
    %c0_19 = arith.constant 0 : index
    %25 = vector.load %arg8[%c0_18, %c0_19] : memref<224x128xbf16, #tpu.memory_space<vmem>>, vector<224x128xbf16>
    %26 = arith.truncf %24 : vector<128x128xf32> to vector<128x128xbf16>
    %cst_20 = arith.constant dense<0.000000e+00> : vector<224x128xf32>
    %27 = tpu.matmul %25, %26, %cst_20 {dimension_numbers = #tpu.dot_dimension_numbers<[1], [0], [0], [1], [0, 0, 1, 1], [], []>} : vector<224x128xbf16>, vector<128x128xbf16>, vector<224x128xf32> -> vector<224x128xf32>
    %c0_21 = arith.constant 0 : index
    %c0_22 = arith.constant 0 : index
    %28 = vector.load %arg9[%c0_21, %c0_22] : memref<224x1xf32, #tpu.memory_space<vmem>>, vector<224x1xf32>
    %29 = vector.broadcast %28 : vector<224x1xf32> to vector<224x128xf32>
    %30 = arith.addf %27, %29 : vector<224x128xf32>
    %cst_23 = arith.constant 0.00999999977 : f32
    %31 = vector.broadcast %cst_23 : f32 to vector<224x128xf32>
    %32 = arith.mulf %31, %30 : vector<224x128xf32>
    %33 = arith.maximumf %30, %32 : vector<224x128xf32>
    %c0_24 = arith.constant 0 : index
    %c0_25 = arith.constant 0 : index
    %34 = vector.load %arg10[%c0_24, %c0_25] : memref<224x224xbf16, #tpu.memory_space<vmem>>, vector<224x224xbf16>
    %35 = arith.truncf %33 : vector<224x128xf32> to vector<224x128xbf16>
    %cst_26 = arith.constant dense<0.000000e+00> : vector<224x128xf32>
    %36 = tpu.matmul %34, %35, %cst_26 {dimension_numbers = #tpu.dot_dimension_numbers<[1], [0], [0], [1], [0, 0, 1, 1], [], []>} : vector<224x224xbf16>, vector<224x128xbf16>, vector<224x128xf32> -> vector<224x128xf32>
    %c0_27 = arith.constant 0 : index
    %c0_28 = arith.constant 0 : index
    %37 = vector.load %arg11[%c0_27, %c0_28] : memref<224x1xf32, #tpu.memory_space<vmem>>, vector<224x1xf32>
    %38 = vector.broadcast %37 : vector<224x1xf32> to vector<224x128xf32>
    %39 = arith.addf %36, %38 : vector<224x128xf32>
    %cst_29 = arith.constant 0.000000e+00 : f32
    %40 = vector.broadcast %cst_29 : f32 to vector<224x128xf32>
    %41 = arith.maximumf %39, %40 : vector<224x128xf32>
    %c0_30 = arith.constant 0 : index
    %c0_31 = arith.constant 0 : index
    %42 = vector.load %arg12[%c0_30, %c0_31] : memref<1x224xbf16, #tpu.memory_space<vmem>>, vector<1x224xbf16>
    %43 = arith.truncf %41 : vector<224x128xf32> to vector<224x128xbf16>
    %cst_32 = arith.constant dense<0.000000e+00> : vector<1x128xf32>
    %44 = tpu.matmul %42, %43, %cst_32 {dimension_numbers = #tpu.dot_dimension_numbers<[1], [0], [0], [1], [0, 0, 1, 1], [], []>} : vector<1x224xbf16>, vector<224x128xbf16>, vector<1x128xf32> -> vector<1x128xf32>
    %c0_33 = arith.constant 0 : index
    %c0_34 = arith.constant 0 : index
    %45 = vector.load %arg13[%c0_33, %c0_34] : memref<1x1xf32, #tpu.memory_space<vmem>>, vector<1x1xf32>
    %46 = vector.broadcast %45 : vector<1x1xf32> to vector<1x128xf32>
    %47 = arith.addf %44, %46 : vector<1x128xf32>
    %cst_35 = arith.constant 0.000000e+00 : f32
    %48 = vector.broadcast %cst_35 : f32 to vector<1x128xf32>
    %49 = arith.subf %48, %47 : vector<1x128xf32>
    %50 = math.exp %49 : vector<1x128xf32>
    %cst_36 = arith.constant 1.000000e+00 : f32
    %51 = vector.broadcast %cst_36 : f32 to vector<1x128xf32>
    %52 = arith.addf %51, %50 : vector<1x128xf32>
    %53 = tpu.reciprocal %52 {approx = true} : vector<1x128xf32> -> vector<1x128xf32>
    %c0_37 = arith.constant 0 : index
    %c0_38 = arith.constant 0 : index
    %54 = vector.load %arg14[%c0_37, %c0_38] : memref<1x128xf32, #tpu.memory_space<vmem>>, vector<1x128xf32>
    tpu.vector_store %arg14[%c0_37, %c0_38], %53 {strides = array<i32>} : memref<1x128xf32, #tpu.memory_space<vmem>>, vector<1x128xf32>,
    return
  }
  func.func @transform_0(%arg0: i32) -> (i32, i32) {
    %c0_i32 = arith.constant 0 : i32
    %c0_i32_0 = arith.constant 0 : i32
    return %c0_i32, %arg0 : i32, i32
  }
  func.func @transform_1(%arg0: i32) -> (i32, i32) {
    %c0_i32 = arith.constant 0 : i32
    %c0_i32_0 = arith.constant 0 : i32
    %c0_i32_1 = arith.constant 0 : i32
    return %c0_i32, %c0_i32_0 : i32, i32
  }
  func.func @transform_2(%arg0: i32) -> (i32, i32) {
    %c0_i32 = arith.constant 0 : i32
    %c0_i32_0 = arith.constant 0 : i32
    %c0_i32_1 = arith.constant 0 : i32
    return %c0_i32, %c0_i32_0 : i32, i32
  }
  func.func @transform_3(%arg0: i32) -> (i32, i32) {
    %c0_i32 = arith.constant 0 : i32
    %c0_i32_0 = arith.constant 0 : i32
    %c0_i32_1 = arith.constant 0 : i32
    return %c0_i32, %c0_i32_0 : i32, i32
  }
  func.func @transform_4(%arg0: i32) -> (i32, i32) {
    %c0_i32 = arith.constant 0 : i32
    %c0_i32_0 = arith.constant 0 : i32
    %c0_i32_1 = arith.constant 0 : i32
    return %c0_i32, %c0_i32_0 : i32, i32
  }
  func.func @transform_5(%arg0: i32) -> (i32, i32) {
    %c0_i32 = arith.constant 0 : i32
    %c0_i32_0 = arith.constant 0 : i32
    %c0_i32_1 = arith.constant 0 : i32
    return %c0_i32, %c0_i32_0 : i32, i32
  }
  func.func @transform_6(%arg0: i32) -> (i32, i32) {
    %c0_i32 = arith.constant 0 : i32
    %c0_i32_0 = arith.constant 0 : i32
    %c0_i32_1 = arith.constant 0 : i32
    return %c0_i32, %c0_i32_0 : i32, i32
  }
  func.func @transform_7(%arg0: i32) -> (i32, i32) {
    %c0_i32 = arith.constant 0 : i32
    %c0_i32_0 = arith.constant 0 : i32
    %c0_i32_1 = arith.constant 0 : i32
    return %c0_i32, %c0_i32_0 : i32, i32
  }
  func.func @transform_8(%arg0: i32) -> (i32, i32) {
    %c0_i32 = arith.constant 0 : i32
    %c0_i32_0 = arith.constant 0 : i32
    %c0_i32_1 = arith.constant 0 : i32
    return %c0_i32, %c0_i32_0 : i32, i32
  }
  func.func @transform_9(%arg0: i32) -> (i32, i32) {
    %c0_i32 = arith.constant 0 : i32
    %c0_i32_0 = arith.constant 0 : i32
    %c0_i32_1 = arith.constant 0 : i32
    return %c0_i32, %c0_i32_0 : i32, i32
  }
  func.func @transform_10(%arg0: i32) -> (i32, i32) {
    %c0_i32 = arith.constant 0 : i32
    %c0_i32_0 = arith.constant 0 : i32
    %c0_i32_1 = arith.constant 0 : i32
    return %c0_i32, %c0_i32_0 : i32, i32
  }
  func.func @transform_11(%arg0: i32) -> (i32, i32) {
    %c0_i32 = arith.constant 0 : i32
    %c0_i32_0 = arith.constant 0 : i32
    %c0_i32_1 = arith.constant 0 : i32
    return %c0_i32, %c0_i32_0 : i32, i32
  }
  func.func @transform_12(%arg0: i32) -> (i32, i32) {
    %c0_i32 = arith.constant 0 : i32
    %c0_i32_0 = arith.constant 0 : i32
    %c0_i32_1 = arith.constant 0 : i32
    return %c0_i32, %c0_i32_0 : i32, i32
  }
  func.func @transform_13(%arg0: i32) -> (i32, i32) {
    %c0_i32 = arith.constant 0 : i32
    %c0_i32_0 = arith.constant 0 : i32
    return %c0_i32, %arg0 : i32, i32
  }
}

</mosaic_0001>

<bundles_post_ra>
// kernel: tpu_custom_call.1
= control target key start
LH: loop header
LB: loop body
LE: loop exit
PB: predicated region body
PF: predicated region fallthrough
CT: control target
= control target key end

     0   :  { %s3304_s0 = inlined_call_operand.vmem [shape: f32[4,256], index: 0, kind: input, shape index: {}]   ;;  %s3305_s1 = inlined_call_operand.vmem [shape: f32[32,4], index: 1, kind: input, shape index: {}]   ;;  %s3306_s2 = inlined_call_operand.vmem [shape: f32[32,1], index: 2, kind: input, shape index: {}]   ;;  %s3307_s3 = inlined_call_operand.vmem [shape: f32[64,32], index: 3, kind: input, shape index: {}]   ;;  %s3308_s4 = inlined_call_operand.vmem [shape: f32[64,1], index: 4, kind: input, shape index: {}]   ;;  %s3309_s5 = inlined_call_operand.vmem [shape: f32[128,64], index: 5, kind: input, shape index: {}]   ;;  %s3310_s6 = inlined_call_operand.vmem [shape: f32[128,1], index: 6, kind: input, shape index: {}]   ;;  %s3311_s7 = inlined_call_operand.vmem [shape: bf16[224,128], index: 7, kind: input, shape index: {}]   ;;  %s3312_s8 = inlined_call_operand.vmem [shape: f32[224,1], index: 8, kind: input, shape index: {}]   ;;  %s3313_s9 = inlined_call_operand.vmem [shape: bf16[224,224], index: 9, kind: input, shape index: {}]   ;;  %s3314_s10 = inlined_call_operand.vmem [shape: f32[224,1], index: 10, kind: input, shape index: {}]   ;;  %s3315_s11 = inlined_call_operand.vmem [shape: bf16[1,224], index: 11, kind: input, shape index: {}]   ;;  %s3316_s12 = inlined_call_operand.<no memory space> [shape: f32[1,1], index: 12, kind: input, shape index: {}]   ;;  %s3317_s13 = inlined_call_operand.hbm [shape: f32[1,256], index: 13, kind: output, shape index: {}]  }
   0x1   :  { %3319 = sst [smem:[#allocation8_spill]] %s3304_s0  ;;  %v18_v0 = vstv %s3316_s12 }
   0x2   :  { %19 = vst [vmem:[#allocation2] sm:$0x1] %v18_v0 }
   0x3   :  { %20 = vsyncpa [#allocation4], 0 }
   0x4   :  { %22 = vsyncpa [#allocation4 + $0x1], 0  ;;  %s2480_s27 = smov 0   ;;  %s2482_s28 = smov 0  }
   0x5   :  { %s2484_s29 = smov 0   ;;  %s2486_s30 = smov 0  }
   0x6 LB: > { %3320 = sst [smem:[#allocation6_spill]] %s2400_s29  ;;  %s2501_s12 = sadd.s32 4294967295, %s2404_s30   ;;  %s2404_s30 = sphi %s2486_s30, %s3330_s30   ;;  %s2400_s29 = sphi %s2484_s29, %s3329_s29   ;;  %s2396_s28 = sphi %s2482_s28, %s3328_s28   ;;  %s2392_s27 = sphi %s2480_s27, %s3327_s27  }
   0x7   : > { %s2034_s14 = sadd.s32 4294967294, %s2404_s30   ;;  %s2505_s15 = sadd.s32 1, %s2404_s30  }
   0x8   : > { %s313_s16 = sadd.s32 1, %s2400_s29  ;;  %s310_s17 = ssub.s32 %s2404_s30, %s2505_s15 }
   0x9   : > { %p323_p0 = scmp.ne.s32.totalorder %s2400_s29, %s2396_s28  ;;  %p311_p1 = scmp.eq.s32.totalorder %s310_s17, 0 }
   0xa   : > { %p324_p2 = scmp.eq.s32.totalorder %s2501_s12, 1  ;;  %p329_p3 = scmp.ne.s32.totalorder %s2396_s28, %s2392_s27 }
   0xb   : > { %p330_p4 = scmp.eq.s32.totalorder %s2034_s14, 1  ;;  %p2037_p7 = scmp.ge.s32.totalorder %s2404_s30, 1 }
   0xc   : > { %s2516_s18 = scalar_select %p311_p1, %s2400_s29, %s313_s16  }
   0xd   : > { %p2518_p5 = por %p324_p2, %p323_p0  ;;  %p2522_p6 = por %p330_p4, %p329_p3 }
   0xe   : > { %3321 = sst [smem:[#allocation7_spill]] %s2516_s18  ;;  %p391_p8 = scmp.lt.s32.totalorder %s2404_s30, 3 }
  0x10   : > { %p392_p9 = pnand %p2037_p7, %p391_p8 }
  0x11   : > { %p433_p10 = scmp.lt.s32.totalorder (!%p392_p9), %s2501_s12, 1  ;;  %s3324_s0 = sld [smem:[#allocation8_spill]] (!%p392_p9) }
  0x12   : > { %395 = sbr.rel (%p392_p9) target bundleno = 1601 (0x641), region = 72  ;;  %s1975_s29 = scalar_lea.hbm (!%p392_p9), %s3317_s13, %s2501_s12 }
  0x13   : > { %s1979_s24 = sshll.u32 (!%p392_p9), %s1975_s29, 4  ;;  %s1980_s24 = int_to_ptr.hbm [resolvable:$true] %s1979_s24 }
  0x14   : > { %s2356_s14 = sshra.s32 (!%p392_p9), %s1980_s24, 4  ;;  %s2357_s14 = int_to_ptr.hbm [resolvable:$true] %s2356_s14 }
  0x15   : > { %p2363_p0 = scmp.lt.s32.totalorder (!%p392_p9), %s2357_s14, %s3317_s13 }
  0x17   : > { %v446_v1 = vld [vmem:[%s3306_s2 + $0x18] sm:$0xff]  ;;  %v444_v2 = vld [vmem:[%s3306_s2 + $0x8] sm:$0xff]  ;;  %v2406_v3 = vmov 0   ;;  %s434_s25 = scalar_select %p433_p10, %s2501_s12, 1  ;;  %vm480_vm0 = vcmask 1043456   ;;  %v439_v4 = vld [vmem:[%s3305_s1] sm:$0xff] }
  0x18   : > { %2336 = vset.pattern.permute.xlu1 %v2406_v3  ;;  %2335 = vset.pattern.permute.xlu0 %v2406_v3  ;;  %vm467_vm1 = vcmask 31744   ;;  %v445_v6 = vld [vmem:[%s3306_s2 + $0x10] sm:$0xff]  ;;  %v443_v7 = vld [vmem:[%s3306_s2] sm:$0xff]  ;;  %v536_v8 = vld [vmem:[%s3308_s4 + $0x38] sm:$0xff]  ;;  %vm577_vm2 = vcmask 261120   ;;  %vm771_vm3 = vcmask 523264  }
  0x19   : > { %464 = vperm.xlu0 %2335, %v446_v1   ;;  %454 = vperm.xlu1 %2336, %v444_v2   ;;  %s2038_s26 = sshll.u32 %s434_s25, 2  ;;  %v440_v9 = vld [vmem:[%s3305_s1 + $0x8] sm:$0xff]  ;;  %v533_v11 = vld [vmem:[%s3308_s4 + $0x20] sm:$0xff]  ;;  %v535_v12 = vld [vmem:[%s3308_s4 + $0x30] sm:$0xff]  ;;  %vm1676_vm4 = vcmask 785408   ;;  %s2362_s12 = scalar_lea.hbm %s3317_s13, 2 }
  0x1a   : > { %2337 = vset.pattern.permute.xlu2 %v2406_v3  ;;  %s436_s17 = scalar_lea.vmem %s3324_s0, %s2038_s26  ;;  %v534_v10 = vld [vmem:[%s3308_s4 + $0x28] sm:$0xff]  ;;  %v441_v13 = vld [vmem:[%s3305_s1 + $0x10] sm:$0xff]  ;;  %v532_v16 = vld [vmem:[%s3308_s4 + $0x18] sm:$0xff]  ;;  %s2358_s26 = scalar_lea.hbm %s2357_s14, 1 }
  0x1b   : > { %v438_v5 = vld [vmem:[%s436_s17] sm:$0xf]  ;;  %574 = vperm.xlu2 %2337, %v536_v8   ;;  %v531_v14 = vld [vmem:[%s3308_s4 + $0x10] sm:$0xff]  ;;  %v530_v15 = vld [vmem:[%s3308_s4 + $0x8] sm:$0xff]  ;;  %s431_s17 = sand.u32 1, %s2396_s28   ;;  %p2359_p11 = scmp.ne.s32.totalorder %s2357_s14, %s2358_s26 }
  0x1c   : > { %2039 = vmatpush.msk.msra.mxu0 %vm480_vm0, %v438_v5  ;;  %v442_v17 = vld [vmem:[%s3305_s1 + $0x18] sm:$0xff]  ;;  %v689_v18 = vld [vmem:[%s3310_s6 + $0x70] sm:$0xff]  ;;  %v529_v20 = vld [vmem:[%s3308_s4] sm:$0xff]  ;;  %s432_s18 = scalar_lea.vmem [#allocation3], %s431_s17  ;;  %s1967_s25 = scalar_lea.sflag [#allocation4], %s431_s17 }
  0x1d   : > { %2040 = vmatmul.msk.f32.vlgmr.msra.gmra.mxu0 %vm467_vm1, %v439_v4  ;;  %v690_v19 = vld [vmem:[%s3310_s6 + $0x78] sm:$0xff]  ;;  %v688_v21 = vld [vmem:[%s3310_s6 + $0x68] sm:$0xff]  ;;  %v685_v22 = vld [vmem:[%s3310_s6 + $0x50] sm:$0xff]  ;;  %s1977_s23 = sshll.u32 %s432_s18, 4  ;;  %p2360_p12 = pnand %p2359_p11, %p2518_p5  ;;  %s1978_s23 = int_to_ptr.vmem [resolvable:$true] %s1977_s23 }
  0x1e   : > { %v687_v23 = vld [vmem:[%s3310_s6 + $0x60] sm:$0xff]  ;;  %v684_v25 = vld [vmem:[%s3310_s6 + $0x48] sm:$0xff]  ;;  %v686_v26 = vld [vmem:[%s3310_s6 + $0x58] sm:$0xff]  ;;  %p2364_p1 = scmp.lt.s32.totalorder %s2362_s12, %s2358_s26 }
  0x1f   : > { %v683_v24 = vld [vmem:[%s3310_s6 + $0x40] sm:$0xff]  ;;  %v682_v27 = vld [vmem:[%s3310_s6 + $0x38] sm:$0xff]  ;;  %v681_v29 = vld [vmem:[%s3310_s6 + $0x30] sm:$0xff]  ;;  %p2361_p13 = pneg %p2360_p12 }
  0x20   : > { %v679_v28 = vld [vmem:[%s3310_s6 + $0x20] sm:$0xff]  ;;  %v677_v30 = vld [vmem:[%s3310_s6 + $0x10] sm:$0xff]  ;;  %v678_v31 = vld [vmem:[%s3310_s6 + $0x18] sm:$0xff]  ;;  %p2365_p2 = por %p2364_p1, %p2363_p0 }
  0x21   : > { %459 = vperm.xlu0 %2335, %v445_v6   ;;  %449 = vperm.xlu1 %2336, %v443_v7   ;;  %v680_v32 = vld [vmem:[%s3310_s6 + $0x28] sm:$0xff]  ;;  %v967_v34 = vld [vmem:[%s3312_s8 + $0x70] sm:$0xff]  ;;  %v675_v35 = vld [vmem:[%s3310_s6] sm:$0xff] }
  0x22   : > { %v676_v33 = vld [vmem:[%s3310_s6 + $0x8] sm:$0xff]  ;;  %v965_v36 = vld [vmem:[%s3312_s8 + $0x60] sm:$0xff]  ;;  %v968_v38 = vld [vmem:[%s3312_s8 + $0x78] sm:$0xff]  ;;  %p2366_p3 = pnand %p2365_p2, %p2361_p13 }
  0x23   : > { %569 = vperm.xlu2 %2337, %v535_v12   ;;  %v966_v37 = vld [vmem:[%s3312_s8 + $0x68] sm:$0xff]  ;;  %v964_v39 = vld [vmem:[%s3312_s8 + $0x58] sm:$0xff]  ;;  %v979_v40 = vld [vmem:[%s3312_s8 + $0xd0] sm:$0xff] }
  0x24   : > { %v963_v41 = vld [vmem:[%s3312_s8 + $0x50] sm:$0xff]  ;;  %v961_v42 = vld [vmem:[%s3312_s8 + $0x40] sm:$0xff]  ;;  %v962_v43 = vld [vmem:[%s3312_s8 + $0x48] sm:$0xff] }
  0x25   : > { %2041 = vmatmul.msk.f32.gmra.mxu0 %vm467_vm1, %v440_v9  ;;  %v980_v44 = vld [vmem:[%s3312_s8 + $0xd8] sm:$0xff]  ;;  %v978_v45 = vld [vmem:[%s3312_s8 + $0xc8] sm:$0xff]  ;;  %v959_v46 = vld [vmem:[%s3312_s8 + $0x30] sm:$0xff] }
  0x26   : > { %v977_v47 = vld [vmem:[%s3312_s8 + $0xc0] sm:$0xff]  ;;  %v975_v48 = vld [vmem:[%s3312_s8 + $0xb0] sm:$0xff]  ;;  %v976_v49 = vld [vmem:[%s3312_s8 + $0xb8] sm:$0xff] }
  0x27   : > { %v960_v50 = vld [vmem:[%s3312_s8 + $0x38] sm:$0xff]  ;;  %v958_v51 = vld [vmem:[%s3312_s8 + $0x28] sm:$0xff]  ;;  %v973_v52 = vld [vmem:[%s3312_s8 + $0xa0] sm:$0xff] }
  0x28   : > { %v957_v53 = vld [vmem:[%s3312_s8 + $0x20] sm:$0xff]  ;;  %v955_v54 = vld [vmem:[%s3312_s8 + $0x10] sm:$0xff]  ;;  %v956_v55 = vld [vmem:[%s3312_s8 + $0x18] sm:$0xff] }
  0x29   : > { %564 = vperm.xlu0 %2335, %v534_v10   ;;  %559 = vperm.xlu1 %2336, %v533_v11   ;;  %v974_v56 = vld [vmem:[%s3312_s8 + $0xa8] sm:$0xff]  ;;  %v972_v58 = vld [vmem:[%s3312_s8 + $0x98] sm:$0xff]  ;;  %v953_v59 = vld [vmem:[%s3312_s8] sm:$0xff] }
  0x2a   : > { %v971_v60 = vld [vmem:[%s3312_s8 + $0x90] sm:$0xff]  ;;  %v969_v62 = vld [vmem:[%s3312_s8 + $0x80] sm:$0xff]  ;;  %v970_v63 = vld [vmem:[%s3312_s8 + $0x88] sm:$0xff] }
  0x2b   : > { %554 = vperm.xlu2 %2337, %v532_v16   ;;  %v954_v1 = vld [vmem:[%s3312_s8 + $0x8] sm:$0xff]  ;;  %v1397_v4 = vld [vmem:[%s3314_s10 + $0x78] sm:$0xff]  ;;  %v1394_v5 = vld [vmem:[%s3314_s10 + $0x60] sm:$0xff] }
  0x2c   : > { %v1396_v6 = vld [vmem:[%s3314_s10 + $0x70] sm:$0xff] }
  0x2d   : > { %2042 = vmatmul.msk.f32.gmra.mxu0 %vm467_vm1, %v441_v13  ;;  %v1392_v12 = vld [vmem:[%s3314_s10 + $0x50] sm:$0xff]  ;;  %v1393_v13 = vld [vmem:[%s3314_s10 + $0x58] sm:$0xff] }
  0x31   : > { %549 = vperm.xlu0 %2335, %v531_v14   ;;  %544 = vperm.xlu1 %2336, %v530_v15  }
  0x33   : > { %539 = vperm.xlu2 %2337, %v529_v20   ;;  %v1395_v20 = vld [vmem:[%s3314_s10 + $0x68] sm:$0xff] }
  0x35   : > { %2043 = vmatmul.msk.f32.gmra.mxu0 %vm467_vm1, %v442_v17 }
  0x39   : > { %763 = vperm.xlu0 %2335, %v689_v18   ;;  %768 = vperm.xlu1 %2336, %v690_v19  }
  0x3b   : > { %753 = vperm.xlu2 %2337, %v687_v23  }
  0x41   : > { %758 = vperm.xlu0 %2335, %v688_v21   ;;  %743 = vperm.xlu1 %2336, %v685_v22  }
  0x43   : > { %748 = vperm.xlu2 %2337, %v686_v26  }
  0x49   : > { %733 = vperm.xlu0 %2335, %v683_v24   ;;  %738 = vperm.xlu1 %2336, %v684_v25   ;;  %v1391_v24 = vld [vmem:[%s3314_s10 + $0x48] sm:$0xff]  ;;  %v1388_v25 = vld [vmem:[%s3314_s10 + $0x30] sm:$0xff] }
  0x4b   : > { %723 = vperm.xlu2 %2337, %v681_v29   ;;  %v1386_v29 = vld [vmem:[%s3314_s10 + $0x20] sm:$0xff] }
  0x51   : > { %728 = vperm.xlu0 %2335, %v682_v27   ;;  %713 = vperm.xlu1 %2336, %v679_v28   ;;  %v521_v27 = vld [vmem:[%s3307_s3] sm:$0xff] }
  0x52   : > { %v1390_v28 = vld [vmem:[%s3314_s10 + $0x40] sm:$0xff] }
  0x53   : > { %718 = vperm.xlu2 %2337, %v680_v32   ;;  %v1389_v32 = vld [vmem:[%s3314_s10 + $0x38] sm:$0xff] }
  0x59   : > { %703 = vperm.xlu0 %2335, %v677_v30   ;;  %708 = vperm.xlu1 %2336, %v678_v31   ;;  %v1387_v30 = vld [vmem:[%s3314_s10 + $0x28] sm:$0xff] }
  0x5a   : > { %v522_v31 = vld [vmem:[%s3307_s3 + $0x8] sm:$0xff] }
  0x5b   : > { %693 = vperm.xlu2 %2337, %v675_v35   ;;  %v523_v35 = vld [vmem:[%s3307_s3 + $0x10] sm:$0xff] }
  0x61   : > { %698 = vperm.xlu0 %2335, %v676_v33   ;;  %1053 = vperm.xlu1 %2336, %v967_v34   ;;  %v1385_v33 = vld [vmem:[%s3314_s10 + $0x18] sm:$0xff]  ;;  %v1408_v34 = vld [vmem:[%s3314_s10 + $0xd0] sm:$0xff] }
  0x63   : > { %1058 = vperm.xlu2 %2337, %v968_v38   ;;  %v1383_v38 = vld [vmem:[%s3314_s10 + $0x8] sm:$0xff] }
  0x69   : > { %1043 = vperm.xlu0 %2335, %v965_v36   ;;  %1048 = vperm.xlu1 %2336, %v966_v37   ;;  %v1384_v36 = vld [vmem:[%s3314_s10 + $0x10] sm:$0xff]  ;;  %v1382_v37 = vld [vmem:[%s3314_s10] sm:$0xff] }
  0x6b   : > { %1033 = vperm.xlu2 %2337, %v963_v41   ;;  %v1407_v41 = vld [vmem:[%s3314_s10 + $0xc8] sm:$0xff] }
  0x71   : > { %1038 = vperm.xlu0 %2335, %v964_v39   ;;  %1113 = vperm.xlu1 %2336, %v979_v40   ;;  %v524_v39 = vld [vmem:[%s3307_s3 + $0x18] sm:$0xff] }
  0x72   : > { %v1409_v40 = vld [vmem:[%s3314_s10 + $0xd8] sm:$0xff] }
  0x73   : > { %1118 = vperm.xlu2 %2337, %v980_v44   ;;  %v1406_v44 = vld [vmem:[%s3314_s10 + $0xc0] sm:$0xff] }
  0x79   : > { %1023 = vperm.xlu0 %2335, %v961_v42   ;;  %1028 = vperm.xlu1 %2336, %v962_v43   ;;  %v1404_v42 = vld [vmem:[%s3314_s10 + $0xb0] sm:$0xff]  ;;  %v525_v43 = vld [vmem:[%s3307_s3 + $0x20] sm:$0xff] }
  0x7b   : > { %1103 = vperm.xlu2 %2337, %v977_v47   ;;  %v526_v47 = vld [vmem:[%s3307_s3 + $0x28] sm:$0xff] }
  0x81   : > { %1108 = vperm.xlu0 %2335, %v978_v45   ;;  %1013 = vperm.xlu1 %2336, %v959_v46   ;;  %v1402_v45 = vld [vmem:[%s3314_s10 + $0xa0] sm:$0xff]  ;;  %v1403_v46 = vld [vmem:[%s3314_s10 + $0xa8] sm:$0xff] }
  0x83   : > { %1018 = vperm.xlu2 %2337, %v960_v50   ;;  %v1398_v50 = vld [vmem:[%s3314_s10 + $0x80] sm:$0xff] }
  0x89   : > { %1093 = vperm.xlu0 %2335, %v975_v48   ;;  %1098 = vperm.xlu1 %2336, %v976_v49   ;;  %v1405_v48 = vld [vmem:[%s3314_s10 + $0xb8] sm:$0xff] }
  0x8a   : > { %v1401_v49 = vld [vmem:[%s3314_s10 + $0x98] sm:$0xff] }
  0x8b   : > { %1003 = vperm.xlu2 %2337, %v957_v53   ;;  %v465_v0 = vpop.permute.xlu0 %464  ;;  %v455_v3 = vpop.permute.xlu1 %454  ;;  %v1920_v53 = vld [vmem:[#allocation2] sm:$0x1] }
  0x91   : > { %1008 = vperm.xlu0 %2335, %v958_v51   ;;  %1083 = vperm.xlu1 %2336, %v973_v52   ;;  %v527_v51 = vld [vmem:[%s3307_s3 + $0x30] sm:$0xff] }
  0x92   : > { %v1400_v52 = vld [vmem:[%s3314_s10 + $0x90] sm:$0xff] }
  0x93   : > { %1088 = vperm.xlu2 %2337, %v974_v56   ;;  %v460_v7 = vpop.permute.xlu0 %459  ;;  %v450_v14 = vpop.permute.xlu1 %449 }
  0x99   : > { %993 = vperm.xlu0 %2335, %v955_v54   ;;  %998 = vperm.xlu1 %2336, %v956_v55   ;;  %v528_v54 = vld [vmem:[%s3307_s3 + $0x38] sm:$0xff]  ;;  %v1399_v55 = vld [vmem:[%s3314_s10 + $0x88] sm:$0xff] }
  0x9a   : > { %v501_v57 = vpop.f32.mrf.mxu0 }
  0x9b   : > { %1073 = vperm.xlu2 %2337, %v971_v60   ;;  %v502_v17 = vadd.f32 %v501_v57, %v450_v14 }
  0x9d   : > { %v513_v22 = vmul.f32 0.01, %v502_v17 }
  0x9f   : > { %v517_v26 = vmax.f32 %v502_v17, %v513_v22 }
  0xa1   : > { %1078 = vperm.xlu0 %2335, %v972_v58   ;;  %983 = vperm.xlu1 %2336, %v953_v59  }
  0xa2   : > { %v504_v61 = vpop.f32.mrf.mxu0 }
  0xa3   : > { %988 = vperm.xlu2 %2337, %v954_v1   ;;  %v505_v10 = vadd.f32 %v504_v61, %v455_v3  ;;  %v575_v61 = vpop.permute.xlu2 %574  ;;  %v565_v1 = vpop.permute.xlu0 %564 }
  0xa5   : > { %v514_v19 = vmul.f32 0.01, %v505_v10 }
  0xa7   : > { %v518_v23 = vmax.f32 %v505_v10, %v514_v19 }
  0xa9   : > { %1063 = vperm.xlu0 %2335, %v969_v62   ;;  %1068 = vperm.xlu1 %2336, %v970_v63  }
  0xaa   : > { %v507_v2 = vpop.f32.mrf.mxu0 }
  0xab   : > { %1482 = vperm.xlu2 %2337, %v1396_v6   ;;  %v508_v8 = vadd.f32 %v507_v2, %v460_v7  ;;  %v570_v63 = vpop.permute.xlu2 %569  ;;  %v560_v2 = vpop.permute.xlu1 %559 }
  0xac   : > { %v550_v14 = vpop.permute.xlu0 %549 }
  0xad   : > { %v515_v15 = vmul.f32 0.01, %v508_v8 }
  0xaf   : > { %v519_v21 = vmax.f32 %v508_v8, %v515_v15 }
  0xb1   : > { %1487 = vperm.xlu0 %2335, %v1397_v4   ;;  %1472 = vperm.xlu1 %2336, %v1394_v5  }
  0xb2   : > { %v510_v9 = vpop.f32.mrf.mxu0 }
  0xb3   : > { %v511_v11 = vadd.f32 %v510_v9, %v465_v0  ;;  %1477 = vperm.xlu2 %2337, %v1395_v20   ;;  %v555_v4 = vpop.permute.xlu2 %554 }
  0xb5   : > { %v516_v16 = vmul.f32 0.01, %v511_v11 }
  0xb7   : > { %v520_v18 = vmax.f32 %v511_v11, %v516_v16 }
  0xb9   : > { %1462 = vperm.xlu0 %2335, %v1392_v12   ;;  %1467 = vperm.xlu1 %2336, %v1393_v13  }
  0xba   : > { %614 = vmatpush.msra.mxu2 %v520_v18  ;;  %v545_v18 = vpop.permute.xlu1 %544 }
  0xbb   : > { %1452 = vperm.xlu2 %2337, %v1390_v28   ;;  %v540_v22 = vpop.permute.xlu2 %539 }
  0xbc   : > { %615 = vmatpush.msra.mxu2 %v519_v21 }
  0xbe   : > { %616 = vmatpush.msra.mxu2 %v518_v23 }
  0xc0   : > { %617 = vmatpush.msra.mxu2 %v517_v26 }
  0xc1   : > { %1457 = vperm.xlu0 %2335, %v1391_v24   ;;  %1442 = vperm.xlu1 %2336, %v1388_v25  }
  0xc2   : > { %2044 = vmatmul.msk.f32.vlgmr.msra.gmra.mxu2 %vm577_vm2, %v521_v27 }
  0xc3   : > { %1447 = vperm.xlu2 %2337, %v1389_v32   ;;  %v659_v32 = vld [vmem:[%s3309_s5] sm:$0xff] }
  0xc9   : > { %1432 = vperm.xlu0 %2335, %v1386_v29   ;;  %1437 = vperm.xlu1 %2336, %v1387_v30  }
  0xca   : > { %2045 = vmatmul.msk.f32.gmra.mxu2 %vm577_vm2, %v522_v31 }
  0xcb   : > { %1422 = vperm.xlu2 %2337, %v1384_v36   ;;  %v663_v36 = vld [vmem:[%s3309_s5 + $0x20] sm:$0xff] }
  0xd1   : > { %1427 = vperm.xlu0 %2335, %v1385_v33   ;;  %1542 = vperm.xlu1 %2336, %v1408_v34   ;;  %v660_v33 = vld [vmem:[%s3309_s5 + $0x8] sm:$0xff]  ;;  %v661_v34 = vld [vmem:[%s3309_s5 + $0x10] sm:$0xff] }
  0xd2   : > { %2046 = vmatmul.msk.f32.gmra.mxu2 %vm577_vm2, %v523_v35  ;;  %v662_v35 = vld [vmem:[%s3309_s5 + $0x18] sm:$0xff] }
  0xd3   : > { %1547 = vperm.xlu2 %2337, %v1409_v40   ;;  %v667_v40 = vld [vmem:[%s3309_s5 + $0x40] sm:$0xff] }
  0xd9   : > { %1412 = vperm.xlu0 %2335, %v1382_v37   ;;  %1417 = vperm.xlu1 %2336, %v1383_v38   ;;  %v664_v37 = vld [vmem:[%s3309_s5 + $0x28] sm:$0xff]  ;;  %v665_v38 = vld [vmem:[%s3309_s5 + $0x30] sm:$0xff] }
  0xda   : > { %2047 = vmatmul.msk.f32.gmra.mxu2 %vm577_vm2, %v524_v39  ;;  %v666_v39 = vld [vmem:[%s3309_s5 + $0x38] sm:$0xff] }
  0xdb   : > { %1532 = vperm.xlu2 %2337, %v1406_v44   ;;  %v2881_v44 = vpop.permute.xlu0 %763 }
  0xe1   : > { %1537 = vperm.xlu0 %2335, %v1407_v41   ;;  %1522 = vperm.xlu1 %2336, %v1404_v42   ;;  %v668_v41 = vld [vmem:[%s3309_s5 + $0x48] sm:$0xff]  ;;  %v669_v42 = vld [vmem:[%s3309_s5 + $0x50] sm:$0xff] }
  0xe2   : > { %2048 = vmatmul.msk.f32.gmra.mxu2 %vm577_vm2, %v525_v43  ;;  %v670_v43 = vld [vmem:[%s3309_s5 + $0x58] sm:$0xff] }
  0xe3   : > { %1527 = vperm.xlu2 %2337, %v1405_v48   ;;  %v672_v48 = vld [vmem:[%s3309_s5 + $0x68] sm:$0xff] }
  0xe9   : > { %1512 = vperm.xlu0 %2335, %v1402_v45   ;;  %1517 = vperm.xlu1 %2336, %v1403_v46   ;;  %v671_v45 = vld [vmem:[%s3309_s5 + $0x60] sm:$0xff]  ;;  %v2886_v46 = vpop.permute.xlu2 %753 }
  0xea   : > { %2049 = vmatmul.msk.f32.gmra.mxu2 %vm577_vm2, %v526_v47  ;;  %v2889_v47 = vpop.permute.xlu0 %758 }
  0xeb   : > { %1502 = vperm.xlu2 %2337, %v1400_v52   ;;  %v769_v52 = vpop.permute.xlu1 %768 }
  0xf1   : > { %1507 = vperm.xlu0 %2335, %v1401_v49   ;;  %1492 = vperm.xlu1 %2336, %v1398_v50   ;;  %v2895_v49 = vpop.permute.xlu2 %748 }
  0xf2   : > { %2050 = vmatmul.msk.f32.gmra.mxu2 %vm577_vm2, %v527_v51  ;;  %v2897_v50 = vpop.permute.xlu0 %733  ;;  %v673_v51 = vld [vmem:[%s3309_s5 + $0x70] sm:$0xff] }
  0xf3   : > { %1497 = vperm.xlu2 %2337, %v1399_v55  }
  0xf9   : > { %1923 = vperm.xlu0 %2335, %v1920_v53   ;;  %v724_v53 = vpop.permute.xlu2 %723 }
  0xfa   : > { %2051 = vmatmul.msk.f32.gmra.mxu2 %vm577_vm2, %v528_v54  ;;  %v674_v54 = vld [vmem:[%s3309_s5 + $0x78] sm:$0xff]  ;;  %v729_v55 = vpop.permute.xlu0 %728 }
 0x145   : > { %v619_v56 = vpop.f32.mrf.mxu2 }
 0x146   : > { %v620_v23 = vadd.f32 %v619_v56, %v540_v22  ;;  %v744_v56 = vpop.permute.xlu1 %743 }
 0x148   : > { %v643_v28 = vmul.f32 0.01, %v620_v23 }
 0x14a   : > { %v651_v31 = vmax.f32 %v620_v23, %v643_v28 }
 0x14d   : > { %v622_v57 = vpop.f32.mrf.mxu2 }
 0x14e   : > { %v623_v19 = vadd.f32 %v622_v57, %v545_v18  ;;  %v719_v57 = vpop.permute.xlu2 %718 }
 0x150   : > { %v644_v27 = vmul.f32 0.01, %v623_v19 }
 0x152   : > { %v652_v30 = vmax.f32 %v623_v19, %v644_v27 }
 0x155   : > { %v625_v58 = vpop.f32.mrf.mxu2 }
 0x156   : > { %v626_v15 = vadd.f32 %v625_v58, %v550_v14  ;;  %v704_v58 = vpop.permute.xlu0 %703 }
 0x158   : > { %v645_v24 = vmul.f32 0.01, %v626_v15 }
 0x15a   : > { %v653_v29 = vmax.f32 %v626_v15, %v645_v24 }
 0x15d   : > { %v628_v59 = vpop.f32.mrf.mxu2 }
 0x15e   : > { %v629_v11 = vadd.f32 %v628_v59, %v555_v4 }
 0x160   : > { %v646_v21 = vmul.f32 0.01, %v629_v11 }
 0x162   : > { %v654_v26 = vmax.f32 %v629_v11, %v646_v21 }
 0x165   : > { %v631_v60 = vpop.f32.mrf.mxu2 }
 0x166   : > { %v632_v8 = vadd.f32 %v631_v60, %v560_v2  ;;  %v739_v60 = vpop.permute.xlu1 %738 }
 0x168   : > { %v647_v16 = vmul.f32 0.01, %v632_v8 }
 0x16a   : > { %v655_v25 = vmax.f32 %v632_v8, %v647_v16 }
 0x16d   : > { %v634_v62 = vpop.f32.mrf.mxu2 }
 0x16e   : > { %v635_v6 = vadd.f32 %v634_v62, %v565_v1 }
 0x170   : > { %v648_v12 = vmul.f32 0.01, %v635_v6 }
 0x172   : > { %v656_v20 = vmax.f32 %v635_v6, %v648_v12  ;;  %v714_v6 = vpop.permute.xlu1 %713 }
 0x175   : > { %v637_v0 = vpop.f32.mrf.mxu2 }
 0x176   : > { %v638_v3 = vadd.f32 %v637_v0, %v570_v63  ;;  %v699_v63 = vpop.permute.xlu0 %698 }
 0x178   : > { %v649_v9 = vmul.f32 0.01, %v638_v3 }
 0x17a   : > { %v657_v17 = vmax.f32 %v638_v3, %v649_v9 }
 0x17d   : > { %v640_v5 = vpop.f32.mrf.mxu2 }
 0x17e   : > { %v641_v7 = vadd.f32 %v640_v5, %v575_v61  ;;  %v694_v61 = vpop.permute.xlu2 %693 }
 0x180   : > { %v650_v10 = vmul.f32 0.01, %v641_v7 }
 0x182   : > { %v658_v13 = vmax.f32 %v641_v7, %v650_v10  ;;  %v709_v10 = vpop.permute.xlu1 %708 }
 0x184   : > { %828 = vmatpush.msrb.mxu2 %v658_v13 }
 0x186   : > { %829 = vmatpush.msrb.mxu2 %v657_v17 }
 0x188   : > { %830 = vmatpush.msrb.mxu2 %v656_v20 }
 0x18a   : > { %831 = vmatpush.msrb.mxu2 %v655_v25 }
 0x18c   : > { %832 = vmatpush.msrb.mxu2 %v654_v26 }
 0x18e   : > { %833 = vmatpush.msrb.mxu2 %v653_v29 }
 0x190   : > { %834 = vmatpush.msrb.mxu2 %v652_v30 }
 0x192   : > { %835 = vmatpush.msrb.mxu2 %v651_v31 }
 0x193   : > { %2052 = vmatmul.msk.f32.vlgmr.msrb.gmra.mxu2 %vm771_vm3, %v659_v32 }
 0x19b   : > { %2053 = vmatmul.msk.f32.gmra.mxu2 %vm771_vm3, %v660_v33 }
 0x1a3   : > { %2054 = vmatmul.msk.f32.gmra.mxu2 %vm771_vm3, %v661_v34 }
 0x1ab   : > { %2055 = vmatmul.msk.f32.gmra.mxu2 %vm771_vm3, %v662_v35 }
 0x1b3   : > { %2056 = vmatmul.msk.f32.gmra.mxu2 %vm771_vm3, %v663_v36 }
 0x1bb   : > { %2057 = vmatmul.msk.f32.gmra.mxu2 %vm771_vm3, %v664_v37 }
 0x1c3   : > { %2058 = vmatmul.msk.f32.gmra.mxu2 %vm771_vm3, %v665_v38 }
 0x1cb   : > { %2059 = vmatmul.msk.f32.gmra.mxu2 %vm771_vm3, %v666_v39 }
 0x1d3   : > { %2060 = vmatmul.msk.f32.gmra.mxu2 %vm771_vm3, %v667_v40 }
 0x1db   : > { %2061 = vmatmul.msk.f32.gmra.mxu2 %vm771_vm3, %v668_v41 }
 0x1e3   : > { %2062 = vmatmul.msk.f32.gmra.mxu2 %vm771_vm3, %v669_v42 }
 0x1eb   : > { %2063 = vmatmul.msk.f32.gmra.mxu2 %vm771_vm3, %v670_v43 }
 0x1f3   : > { %2064 = vmatmul.msk.f32.gmra.mxu2 %vm771_vm3, %v671_v45 }
 0x1fb   : > { %2065 = vmatmul.msk.f32.gmra.mxu2 %vm771_vm3, %v672_v48 }
 0x203   : > { %2066 = vmatmul.msk.f32.gmra.mxu2 %vm771_vm3, %v673_v51 }
 0x20b   : > { %2067 = vmatmul.msk.f32.gmra.mxu2 %vm771_vm3, %v674_v54 }
 0x216   : > { %v837_v59 = vpop.f32.mrf.mxu2 }
 0x217   : > { %v838_v62 = vadd.f32 %v837_v59, %v694_v61 }
 0x219   : > { %v885_v1 = vmul.f32 0.01, %v838_v62 }
 0x21b   : > { %v901_v4 = vmax.f32 %v838_v62, %v885_v1 }
 0x21e   : > { %v840_v0 = vpop.f32.mrf.mxu2 }
 0x21f   : > { %v841_v2 = vadd.f32 %v840_v0, %v699_v63 }
 0x221   : > { %v886_v3 = vmul.f32 0.01, %v841_v2 }
 0x223   : > { %v902_v5 = vmax.f32 %v841_v2, %v886_v3 }
 0x225   : > { %v2907_v7 = vpack.c.bf16 %v902_v5, %v901_v4 }
 0x226   : > { %v843_v8 = vpop.f32.mrf.mxu2 }
 0x227   : > { %v844_v9 = vadd.f32 %v843_v8, %v704_v58 }
 0x229   : > { %v887_v12 = vmul.f32 0.01, %v844_v9 }
 0x22b   : > { %v903_v15 = vmax.f32 %v844_v9, %v887_v12  ;;  %v2256_v12 = vld [vmem:[%s3311_s7 + $0x18] sm:$0xff] }
 0x22e   : > { %v846_v11 = vpop.f32.mrf.mxu2 }
 0x22f   : > { %v847_v13 = vadd.f32 %v846_v11, %v709_v10  ;;  %v2255_v11 = vld [vmem:[%s3311_s7 + $0x10] sm:$0xff] }
 0x231   : > { %v888_v14 = vmul.f32 0.01, %v847_v13 }
 0x233   : > { %v904_v16 = vmax.f32 %v847_v13, %v888_v14  ;;  %v2927_v13 = vpop.permute.xlu1 %1053  ;;  %v2929_v14 = vpop.permute.xlu2 %1058 }
 0x235   : > { %v946_v17 = vpack.c.bf16 %v904_v16, %v903_v15 }
 0x236   : > { %v849_v18 = vpop.f32.mrf.mxu2 }
 0x237   : > { %v850_v19 = vadd.f32 %v849_v18, %v714_v6  ;;  %v2258_v18 = vld [vmem:[%s3311_s7 + $0x28] sm:$0xff] }
 0x239   : > { %v889_v21 = vmul.f32 0.01, %v850_v19 }
 0x23b   : > { %v905_v24 = vmax.f32 %v850_v19, %v889_v21  ;;  %v2934_v15 = vpop.permute.xlu1 %1048  ;;  %v2936_v16 = vpop.permute.xlu2 %1033 }
 0x23e   : > { %v852_v20 = vpop.f32.mrf.mxu2 }
 0x23f   : > { %v853_v22 = vadd.f32 %v852_v20, %v719_v57 }
 0x241   : > { %v890_v23 = vmul.f32 0.01, %v853_v22 }
 0x243   : > { %v906_v25 = vmax.f32 %v853_v22, %v890_v23  ;;  %v2943_v19 = vpop.permute.xlu2 %1118  ;;  %v2949_v22 = vpop.permute.xlu0 %1043  ;;  %v2259_v23 = vld [vmem:[%s3311_s7 + $0x30] sm:$0xff] }
 0x245   : > { %v947_v26 = vpack.c.bf16 %v906_v25, %v905_v24 }
 0x246   : > { %v855_v27 = vpop.f32.mrf.mxu2 }
 0x247   : > { %v856_v28 = vadd.f32 %v855_v27, %v724_v53 }
 0x249   : > { %v891_v30 = vmul.f32 0.01, %v856_v28 }
 0x24b   : > { %v907_v33 = vmax.f32 %v856_v28, %v891_v30  ;;  %v2947_v21 = vpop.permute.xlu2 %1103  ;;  %v2260_v28 = vld [vmem:[%s3311_s7 + $0x38] sm:$0xff] }
 0x24e   : > { %v858_v29 = vpop.f32.mrf.mxu2 }
 0x24f   : > { %v859_v31 = vadd.f32 %v858_v29, %v729_v55 }
 0x251   : > { %v892_v32 = vmul.f32 0.01, %v859_v31 }
 0x253   : > { %v908_v34 = vmax.f32 %v859_v31, %v892_v32  ;;  %v1019_v25 = vpop.permute.xlu2 %1018 }
 0x255   : > { %v948_v35 = vpack.c.bf16 %v908_v34, %v907_v33  ;;  %v2261_v34 = vld [vmem:[%s3311_s7 + $0x40] sm:$0xff] }
 0x256   : > { %v861_v36 = vpop.f32.mrf.mxu2 }
 0x25b   : > { %v1004_v29 = vpop.permute.xlu2 %1003 }
 0x25e   : > { %v864_v37 = vpop.f32.mrf.mxu2 }
 0x25f   : > { %v865_v0 = vadd.f32 %v864_v37, %v739_v60  ;;  %v2254_v60 = vld [vmem:[%s3311_s7 + $0x8] sm:$0xff] }
 0x263   : > { %v2965_v32 = vpop.permute.xlu2 %1088 }
 0x266   : > { %v867_v38 = vpop.f32.mrf.mxu2 }
 0x267   : > { %v868_v59 = vadd.f32 %v867_v38, %v744_v56 }
 0x26e   : > { %v870_v39 = vpop.f32.mrf.mxu2 }
 0x26f   : > { %v871_v55 = vadd.f32 %v870_v39, %v2895_v49 }
 0x271   : > { %v896_v1 = vmul.f32 0.01, %v871_v55 }
 0x273   : > { %v912_v5 = vmax.f32 %v871_v55, %v896_v1  ;;  %v2263_v1 = vld [vmem:[%s3311_s7 + $0x50] sm:$0xff] }
 0x276   : > { %v873_v40 = vpop.f32.mrf.mxu2 }
 0x277   : > { %v874_v51 = vadd.f32 %v873_v40, %v2886_v46  ;;  %v894_v46 = vmul.f32 0.01, %v865_v0 }
 0x279   : > { %v897_v61 = vmul.f32 0.01, %v874_v51  ;;  %v910_v8 = vmax.f32 %v865_v0, %v894_v46 }
 0x27b   : > { %v913_v4 = vmax.f32 %v874_v51, %v897_v61 }
 0x27e   : > { %v876_v41 = vpop.f32.mrf.mxu2 }
 0x27f   : > { %v877_v45 = vadd.f32 %v876_v41, %v2889_v47  ;;  %v895_v47 = vmul.f32 0.01, %v868_v59 }
 0x281   : > { %v898_v57 = vmul.f32 0.01, %v877_v45  ;;  %v911_v49 = vmax.f32 %v868_v59, %v895_v47 }
 0x283   : > { %v914_v2 = vmax.f32 %v877_v45, %v898_v57  ;;  %v950_v56 = vpack.c.bf16 %v912_v5, %v911_v49  ;;  %v2264_v49 = vld [vmem:[%s3311_s7 + $0x58] sm:$0xff] }
 0x286   : > { %v879_v42 = vpop.f32.mrf.mxu2 }
 0x287   : > { %v880_v43 = vadd.f32 %v879_v42, %v2881_v44  ;;  %v862_v44 = vadd.f32 %v861_v36, %v2897_v50  ;;  %v2253_v50 = vld [vmem:[%s3311_s7] sm:$0xff]  ;;  %v2972_v36 = vpop.permute.xlu2 %1073 }
 0x289   : > { %v899_v53 = vmul.f32 0.01, %v880_v43  ;;  %v893_v6 = vmul.f32 0.01, %v862_v44 }
 0x28b   : > { %v915_v62 = vmax.f32 %v880_v43, %v899_v53  ;;  %v909_v9 = vmax.f32 %v862_v44, %v893_v6 }
 0x28d   : > { %v949_v10 = vpack.c.bf16 %v910_v8, %v909_v9 }
 0x28e   : > { %v882_v48 = vpop.f32.mrf.mxu2 }
 0x28f   : > { %v883_v54 = vadd.f32 %v882_v48, %v769_v52  ;;  %v951_v52 = vpack.c.bf16 %v914_v2, %v913_v4  ;;  %v989_v41 = vpop.permute.xlu2 %988  ;;  %v2262_v48 = vld [vmem:[%s3311_s7 + $0x48] sm:$0xff] }
 0x291   : > { %v900_v58 = vmul.f32 0.01, %v883_v54 }
 0x293   : > { %v916_v63 = vmax.f32 %v883_v54, %v900_v58 }
 0x295   : > { %v952_v3 = vpack.c.bf16 %v916_v63, %v915_v62 }
 0x297   : > { %1205 = vmatpush.bf16.msra.mxu3 %v952_v3 }
 0x29b   : > { %1206 = vmatpush.bf16.msra.mxu3 %v951_v52 }
 0x29f   : > { %1207 = vmatpush.bf16.msra.mxu3 %v950_v56 }
 0x2a3   : > { %1208 = vmatpush.bf16.msra.mxu3 %v949_v10 }
 0x2a7   : > { %1209 = vmatpush.bf16.msra.mxu3 %v948_v35 }
 0x2ab   : > { %1210 = vmatpush.bf16.msra.mxu3 %v947_v26  ;;  %v2954_v26 = vpop.permute.xlu0 %1038 }
 0x2af   : > { %1211 = vmatpush.bf16.msra.mxu3 %v946_v17  ;;  %v2938_v17 = vpop.permute.xlu1 %1113 }
 0x2b3   : > { %1212 = vmatpush.bf16.msra.mxu3 %v2907_v7  ;;  %v2257_v7 = vld [vmem:[%s3311_s7 + $0x20] sm:$0xff]  ;;  %v2961_v30 = vpop.permute.xlu0 %1023 }
 0x2b6   : > { %1213 = vmatmul.bf16.vlgmr.msra.gmra.mxu3 %v2253_v50 }
 0x2b7   : > { %v2945_v20 = vpop.permute.xlu1 %1028 }
 0x2bb   : > { %v2967_v33 = vpop.permute.xlu0 %1108 }
 0x2bf   : > { %v1014_v24 = vpop.permute.xlu1 %1013 }
 0x2c3   : > { %v2974_v37 = vpop.permute.xlu0 %1093 }
 0x2c6   : > { %1218 = vmatmul.bf16.gmra.mxu3 %v2254_v60 }
 0x2c7   : > { %v2956_v27 = vpop.permute.xlu1 %1098 }
 0x2cb   : > { %v1009_v51 = vpop.permute.xlu0 %1008 }
 0x2cf   : > { %v2963_v31 = vpop.permute.xlu1 %1083 }
 0x2d3   : > { %v994_v59 = vpop.permute.xlu0 %993 }
 0x2d6   : > { %1223 = vmatmul.bf16.gmra.mxu3 %v2255_v11 }
 0x2d7   : > { %v999_v35 = vpop.permute.xlu1 %998 }
 0x2df   : > { %v984_v39 = vpop.permute.xlu1 %983 }
 0x2e6   : > { %1228 = vmatmul.bf16.gmra.mxu3 %v2256_v12 }
 0x2f6   : > { %1233 = vmatmul.bf16.gmra.mxu3 %v2257_v7 }
 0x306   : > { %1238 = vmatmul.bf16.gmra.mxu3 %v2258_v18  ;;  %v2265_v18 = vld [vmem:[%s3311_s7 + $0x60] sm:$0xff] }
 0x316   : > { %1243 = vmatmul.bf16.gmra.mxu3 %v2259_v23 }
 0x326   : > { %1248 = vmatmul.bf16.gmra.mxu3 %v2260_v28 }
 0x336   : > { %1253 = vmatmul.bf16.gmra.mxu3 %v2261_v34 }
 0x339   : > { %v1214_v38 = vpop.f32.mrf.mxu3 }
 0x33a   : > { %v1215_v40 = vadd.f32 %v1214_v38, %v984_v39  ;;  %v2266_v39 = vld [vmem:[%s3311_s7 + $0x68] sm:$0xff] }
 0x33c   : > { %v1284_v43 = vmul.f32 0.01, %v1215_v40 }
 0x33e   : > { %v1312_v54 = vmax.f32 %v1215_v40, %v1284_v43 }
 0x341   : > { %v1216_v42 = vpop.f32.mrf.mxu3 }
 0x342   : > { %v1217_v45 = vadd.f32 %v1216_v42, %v989_v41 }
 0x344   : > { %v1285_v53 = vmul.f32 0.01, %v1217_v45 }
 0x346   : > { %1258 = vmatmul.bf16.gmra.mxu3 %v2262_v48  ;;  %v1313_v55 = vmax.f32 %v1217_v45, %v1285_v53 }
 0x348   : > { %v2979_v57 = vpack.c.bf16 %v1313_v55, %v1312_v54  ;;  %v1079_v55 = vpop.permute.xlu0 %1078 }
 0x349   : > { %v1219_v58 = vpop.f32.mrf.mxu3 }
 0x34a   : > { %v1220_v61 = vadd.f32 %v1219_v58, %v994_v59 }
 0x34c   : > { %v1286_v63 = vmul.f32 0.01, %v1220_v61 }
 0x34e   : > { %v1314_v3 = vmax.f32 %v1220_v61, %v1286_v63 }
 0x351   : > { %v1221_v62 = vpop.f32.mrf.mxu3 }
 0x352   : > { %v1222_v0 = vadd.f32 %v1221_v62, %v999_v35 }
 0x354   : > { %v1287_v2 = vmul.f32 0.01, %v1222_v0 }
 0x356   : > { %1263 = vmatmul.bf16.gmra.mxu3 %v2263_v1  ;;  %v1315_v44 = vmax.f32 %v1222_v0, %v1287_v2 }
 0x358   : > { %v2984_v47 = vpack.c.bf16 %v1315_v44, %v1314_v3 }
 0x359   : > { %v1224_v4 = vpop.f32.mrf.mxu3 }
 0x35a   : > { %v1225_v46 = vadd.f32 %v1224_v4, %v1004_v29 }
 0x35c   : > { %v1288_v52 = vmul.f32 0.01, %v1225_v46 }
 0x35e   : > { %v1316_v56 = vmax.f32 %v1225_v46, %v1288_v52  ;;  %v1064_v52 = vpop.permute.xlu0 %1063 }
 0x361   : > { %v1226_v5 = vpop.f32.mrf.mxu3 }
 0x362   : > { %v1227_v6 = vadd.f32 %v1226_v5, %v1009_v51 }
 0x364   : > { %v1289_v8 = vmul.f32 0.01, %v1227_v6 }
 0x366   : > { %v1317_v9 = vmax.f32 %v1227_v6, %v1289_v8  ;;  %1268 = vmatmul.bf16.gmra.mxu3 %v2264_v49 }
 0x368   : > { %v2989_v10 = vpack.c.bf16 %v1317_v9, %v1316_v56 }
 0x369   : > { %v1229_v50 = vpop.f32.mrf.mxu3 }
 0x36a   : > { %v1230_v60 = vadd.f32 %v1229_v50, %v1014_v24 }
 0x36c   : > { %v1290_v12 = vmul.f32 0.01, %v1230_v60 }
 0x36e   : > { %v1318_v28 = vmax.f32 %v1230_v60, %v1290_v12 }
 0x371   : > { %v1231_v11 = vpop.f32.mrf.mxu3 }
 0x372   : > { %v1232_v7 = vadd.f32 %v1231_v11, %v1019_v25 }
 0x374   : > { %v1291_v23 = vmul.f32 0.01, %v1232_v7 }
 0x376   : > { %v1319_v29 = vmax.f32 %v1232_v7, %v1291_v23  ;;  %1273 = vmatmul.bf16.gmra.mxu3 %v2265_v18 }
 0x378   : > { %v1371_v34 = vpack.c.bf16 %v1319_v29, %v1318_v28 }
 0x379   : > { %v1234_v35 = vpop.f32.mrf.mxu3 }
 0x381   : > { %v1236_v38 = vpop.f32.mrf.mxu3 }
 0x386   : > { %1278 = vmatmul.bf16.gmra.mxu3 %v2266_v39 }
 0x389   : > { %v1239_v24 = vpop.f32.mrf.mxu3 }
 0x38a   : > { %v1240_v62 = vadd.f32 %v1239_v24, %v2936_v16  ;;  %v2126_v24 = vld [vmem:[%s3313_s9] sm:$0xf] }
 0x38c   : > { %v1294_v4 = vmul.f32 0.01, %v1240_v62 }
 0x38e   : > { %v1322_v16 = vmax.f32 %v1240_v62, %v1294_v4  ;;  %v2274_v62 = vld [vmem:[%s3313_s9 + $0x34] sm:$0xf0]  ;;  %v2276_v4 = vld [vmem:[%s3313_s9 + $0x44] sm:$0xf0] }
 0x391   : > { %v1241_v40 = vpop.f32.mrf.mxu3 }
 0x392   : > { %v1242_v58 = vadd.f32 %v1241_v40, %v2954_v26  ;;  %v2268_v40 = vld [vmem:[%s3313_s9 + $0x4] sm:$0xf0] }
 0x394   : > { %v1295_v2 = vmul.f32 0.01, %v1242_v58 }
 0x396   : > { %v1323_v26 = vmax.f32 %v1242_v58, %v1295_v2 }
 0x398   : > { %v1373_v56 = vpack.c.bf16 %v1323_v26, %v1322_v16 }
 0x399   : > { %v1244_v41 = vpop.f32.mrf.mxu3 }
 0x39a   : > { %v1245_v51 = vadd.f32 %v1244_v41, %v2949_v22  ;;  %v1235_v22 = vadd.f32 %v1234_v35, %v2961_v30 }
 0x39c   : > { %v1296_v63 = vmul.f32 0.01, %v1245_v51  ;;  %v1292_v6 = vmul.f32 0.01, %v1235_v22 }
 0x39e   : > { %v1320_v50 = vmax.f32 %v1235_v22, %v1292_v6  ;;  %v2158_v22 = vld [vmem:[%s3313_s9 + $0x40] sm:$0xf] }
 0x39f   : > { %v2159_v26 = vor.u32 %v2276_v4, %v2158_v22 }
 0x3a1   : > { %v1246_v25 = vpop.f32.mrf.mxu3 }
 0x3a2   : > { %v1247_v45 = vadd.f32 %v1246_v25, %v2934_v15  ;;  %v2127_v25 = vor.u32 %v2268_v40, %v2126_v24  ;;  %v2269_v40 = vld [vmem:[%s3313_s9 + $0x14] sm:$0xf] }
 0x3a4   : > { %v1297_v59 = vmul.f32 0.01, %v1247_v45 }
 0x3a6   : > { %v1325_v15 = vmax.f32 %v1247_v45, %v1297_v59  ;;  %v2270_v45 = vld [vmem:[%s3313_s9 + $0x14] sm:$0xf0] }
 0x3a9   : > { %v1249_v42 = vpop.f32.mrf.mxu3 }
 0x3aa   : > { %v1250_v43 = vadd.f32 %v1249_v42, %v2927_v13  ;;  %v1237_v13 = vadd.f32 %v1236_v38, %v2945_v20  ;;  %v1069_v20 = vpop.permute.xlu1 %1068 }
 0x3ac   : > { %v1298_v53 = vmul.f32 0.01, %v1250_v43  ;;  %v1293_v46 = vmul.f32 0.01, %v1237_v13 }
 0x3ae   : > { %v1326_v0 = vmax.f32 %v1250_v43, %v1298_v53  ;;  %v1321_v8 = vmax.f32 %v1237_v13, %v1293_v46 }
 0x3b0   : > { %v1372_v12 = vpack.c.bf16 %v1321_v8, %v1320_v50 }
 0x3b1   : > { %v1251_v48 = vpop.f32.mrf.mxu3 }
 0x3b2   : > { %v1252_v54 = vadd.f32 %v1251_v48, %v2929_v14  ;;  %v1324_v14 = vmax.f32 %v1245_v51, %v1296_v63  ;;  %v3130_v4 = vpop.permute.xlu1 %1472 }
 0x3b4   : > { %v1299_v61 = vmul.f32 0.01, %v1252_v54  ;;  %v1374_v5 = vpack.c.bf16 %v1325_v15, %v1324_v14 }
 0x3b6   : > { %v1327_v1 = vmax.f32 %v1252_v54, %v1299_v61  ;;  %v2272_v54 = vld [vmem:[%s3313_s9 + $0x24] sm:$0xf0]  ;;  %v2150_v61 = vld [vmem:[%s3313_s9 + $0x30] sm:$0xf] }
 0x3b7   : > { %v2151_v63 = vor.u32 %v2274_v62, %v2150_v61  ;;  %v2160_v61 = vld [vmem:[%s3313_s9 + $0x48] sm:$0xf0] }
 0x3b8   : > { %v1375_v3 = vpack.c.bf16 %v1327_v1, %v1326_v0 }
 0x3b9   : > { %v1254_v44 = vpop.f32.mrf.mxu3 }
 0x3ba   : > { %1719 = vmatpush.bf16.msrb.mxu0 %v1375_v3  ;;  %v1255_v49 = vadd.f32 %v1254_v44, %v1064_v52 }
 0x3bc   : > { %v1300_v60 = vmul.f32 0.01, %v1255_v49 }
 0x3be   : > { %1720 = vmatpush.bf16.msrb.mxu0 %v1374_v5  ;;  %v1328_v7 = vmax.f32 %v1255_v49, %v1300_v60 }
 0x3c1   : > { %v1256_v9 = vpop.f32.mrf.mxu3 }
 0x3c2   : > { %v1257_v11 = vadd.f32 %v1256_v9, %v1069_v20  ;;  %1721 = vmatpush.bf16.msrb.mxu0 %v1373_v56 }
 0x3c4   : > { %v1301_v30 = vmul.f32 0.01, %v1257_v11 }
 0x3c6   : > { %v1329_v18 = vmax.f32 %v1257_v11, %v1301_v30  ;;  %1722 = vmatpush.bf16.msrb.mxu0 %v1372_v12 }
 0x3c8   : > { %v3005_v23 = vpack.c.bf16 %v1329_v18, %v1328_v7 }
 0x3c9   : > { %v1259_v28 = vpop.f32.mrf.mxu3 }
 0x3ca   : > { %1723 = vmatpush.bf16.msrb.mxu0 %v1371_v34  ;;  %v1260_v29 = vadd.f32 %v1259_v28, %v2972_v36  ;;  %v2267_v28 = vld [vmem:[%s3313_s9 + $0x4] sm:$0xf] }
 0x3cc   : > { %v1302_v38 = vmul.f32 0.01, %v1260_v29 }
 0x3ce   : > { %1724 = vmatpush.bf16.msrb.mxu0 %v2989_v10  ;;  %v1330_v34 = vmax.f32 %v1260_v29, %v1302_v38  ;;  %v2128_v29 = vld [vmem:[%s3313_s9 + $0x8] sm:$0xf0]  ;;  %v2174_v38 = vld [vmem:[%s3313_s9 + $0x60] sm:$0xf] }
 0x3d1   : > { %v1261_v35 = vpop.f32.mrf.mxu3 }
 0x3d2   : > { %v1262_v39 = vadd.f32 %v1261_v35, %v1079_v55  ;;  %1725 = vmatpush.bf16.msrb.mxu0 %v2984_v47  ;;  %v2134_v47 = vld [vmem:[%s3313_s9 + $0x10] sm:$0xf]  ;;  %v2131_v35 = vor.u32 %v2267_v28, %v2128_v29 }
 0x3d3   : > { %v2135_v48 = vor.u32 %v2270_v45, %v2134_v47  ;;  %v2190_v47 = vld [vmem:[%s3313_s9 + $0x80] sm:$0xf]  ;;  %v2284_v45 = vld [vmem:[%s3313_s9 + $0x84] sm:$0xf0] }
 0x3d4   : > { %v1303_v41 = vmul.f32 0.01, %v1262_v39 }
 0x3d6   : > { %v1331_v42 = vmax.f32 %v1262_v39, %v1303_v41  ;;  %1726 = vmatpush.bf16.msrb.mxu0 %v2979_v57  ;;  %v2142_v57 = vld [vmem:[%s3313_s9 + $0x20] sm:$0xf]  ;;  %v2280_v39 = vld [vmem:[%s3313_s9 + $0x64] sm:$0xf0] }
 0x3d7   : > { %v2143_v55 = vor.u32 %v2272_v54, %v2142_v57  ;;  %v2175_v24 = vor.u32 %v2280_v39, %v2174_v38  ;;  %v2198_v54 = vld [vmem:[%s3313_s9 + $0x90] sm:$0xf]  ;;  %v2283_v38 = vld [vmem:[%s3313_s9 + $0x84] sm:$0xf]  ;;  %v2192_v39 = vld [vmem:[%s3313_s9 + $0x88] sm:$0xf0] }
 0x3d8   : > { %v1377_v36 = vpack.c.bf16 %v1331_v42, %v1330_v34  ;;  %v2282_v34 = vld [vmem:[%s3313_s9 + $0x74] sm:$0xf0] }
 0x3d9   : > { %v1264_v10 = vpop.f32.mrf.mxu3  ;;  %1727 = vmatmul.bf16.vlgmr.msrb.gmra.mxu0 %v2127_v25  ;;  %v2182_v25 = vld [vmem:[%s3313_s9 + $0x70] sm:$0xf] }
 0x3da   : > { %v1265_v8 = vadd.f32 %v1264_v10, %v2963_v31  ;;  %v2278_v31 = vld [vmem:[%s3313_s9 + $0x54] sm:$0xf0]  ;;  %v2183_v42 = vor.u32 %v2282_v34, %v2182_v25  ;;  %v2144_v10 = vld [vmem:[%s3313_s9 + $0x28] sm:$0xf0] }
 0x3dc   : > { %v1304_v60 = vmul.f32 0.01, %v1265_v8 }
 0x3de   : > { %v1332_v12 = vmax.f32 %v1265_v8, %v1304_v60  ;;  %v2292_v8 = vld [vmem:[%s3313_s9 + $0xc4] sm:$0xf0]  ;;  %v2184_v60 = vld [vmem:[%s3313_s9 + $0x78] sm:$0xf0] }
 0x3e1   : > { %v1266_v43 = vpop.f32.mrf.mxu3 }
 0x3e9   : > { %v1269_v51 = vpop.f32.mrf.mxu3  ;;  %1732 = vmatmul.bf16.gmra.mxu0 %v2135_v48  ;;  %v2191_v48 = vor.u32 %v2284_v45, %v2190_v47 }
 0x3f1   : > { %v1271_v53 = vpop.f32.mrf.mxu3 }
 0x3f2   : > { %v1272_v14 = vadd.f32 %v1271_v53, %v2956_v27  ;;  %v2152_v53 = vld [vmem:[%s3313_s9 + $0x38] sm:$0xf0] }
 0x3f4   : > { %v1307_v6 = vmul.f32 0.01, %v1272_v14 }
 0x3f6   : > { %v1335_v9 = vmax.f32 %v1272_v14, %v1307_v6  ;;  %v2214_v14 = vld [vmem:[%s3313_s9 + $0xb0] sm:$0xf] }
 0x3f9   : > { %v1274_v58 = vpop.f32.mrf.mxu3  ;;  %1737 = vmatmul.bf16.gmra.mxu0 %v2143_v55  ;;  %v2286_v55 = vld [vmem:[%s3313_s9 + $0x94] sm:$0xf0] }
 0x3fa   : > { %v1275_v15 = vadd.f32 %v1274_v58, %v2947_v21  ;;  %v2199_v58 = vor.u32 %v2286_v55, %v2198_v54 }
 0x3fc   : > { %v1308_v5 = vmul.f32 0.01, %v1275_v15 }
 0x3fe   : > { %v1336_v20 = vmax.f32 %v1275_v15, %v1308_v5  ;;  %v2277_v15 = vld [vmem:[%s3313_s9 + $0x54] sm:$0xf]  ;;  %v2279_v5 = vld [vmem:[%s3313_s9 + $0x64] sm:$0xf] }
 0x401   : > { %v1276_v59 = vpop.f32.mrf.mxu3 }
 0x402   : > { %v1277_v13 = vadd.f32 %v1276_v59, %v2967_v33  ;;  %v1270_v33 = vadd.f32 %v1269_v51, %v2974_v37  ;;  %v2273_v51 = vld [vmem:[%s3313_s9 + $0x34] sm:$0xf]  ;;  %v2275_v59 = vld [vmem:[%s3313_s9 + $0x44] sm:$0xf] }
 0x403   : > { %v2155_v57 = vor.u32 %v2273_v51, %v2152_v53  ;;  %v2163_v62 = vor.u32 %v2275_v59, %v2160_v61  ;;  %v2285_v53 = vld [vmem:[%s3313_s9 + $0x94] sm:$0xf] }
 0x404   : > { %v1309_v46 = vmul.f32 0.01, %v1277_v13  ;;  %v1306_v56 = vmul.f32 0.01, %v1270_v33 }
 0x406   : > { %v1337_v16 = vmax.f32 %v1277_v13, %v1309_v46  ;;  %v1334_v11 = vmax.f32 %v1270_v33, %v1306_v56  ;;  %v2290_v46 = vld [vmem:[%s3313_s9 + $0xb4] sm:$0xf0]  ;;  %v3157_v56 = vpop.permute.xlu2 %1482 }
 0x408   : > { %v1380_v50 = vpack.c.bf16 %v1337_v16, %v1336_v20  ;;  %v1379_v30 = vpack.c.bf16 %v1335_v9, %v1334_v11 }
 0x409   : > { %v1279_v0 = vpop.f32.mrf.mxu3  ;;  %1742 = vmatmul.bf16.gmra.mxu0 %v2151_v63  ;;  %v2206_v63 = vld [vmem:[%s3313_s9 + $0xa0] sm:$0xf] }
 0x40a   : > { %v1280_v1 = vadd.f32 %v1279_v0, %v2938_v17  ;;  %v2288_v0 = vld [vmem:[%s3313_s9 + $0xa4] sm:$0xf0] }
 0x40b   : > { %v2207_v13 = vor.u32 %v2288_v0, %v2206_v63 }
 0x40c   : > { %v1310_v3 = vmul.f32 0.01, %v1280_v1 }
 0x40e   : > { %v1338_v21 = vmax.f32 %v1280_v1, %v1310_v3  ;;  %v2168_v3 = vld [vmem:[%s3313_s9 + $0x58] sm:$0xf0] }
 0x411   : > { %v1281_v2 = vpop.f32.mrf.mxu3 }
 0x412   : > { %v1282_v44 = vadd.f32 %v1281_v2, %v2943_v19  ;;  %v1267_v19 = vadd.f32 %v1266_v43, %v2965_v32  ;;  %v2166_v32 = vld [vmem:[%s3313_s9 + $0x50] sm:$0xf]  ;;  %v3121_v2 = vpop.permute.xlu0 %1487 }
 0x413   : > { %v2167_v18 = vor.u32 %v2278_v31, %v2166_v32  ;;  %v2230_v31 = vld [vmem:[%s3313_s9 + $0xd0] sm:$0xf] }
 0x414   : > { %v1311_v17 = vmul.f32 0.01, %v1282_v44  ;;  %v1305_v27 = vmul.f32 0.01, %v1267_v19 }
 0x416   : > { %v1339_v52 = vmax.f32 %v1282_v44, %v1311_v17  ;;  %v1333_v37 = vmax.f32 %v1267_v19, %v1305_v27  ;;  %v2171_v44 = vor.u32 %v2277_v15, %v2168_v3 }
 0x418   : > { %v1381_v49 = vpack.c.bf16 %v1339_v52, %v1338_v21  ;;  %v1378_v7 = vpack.c.bf16 %v1333_v37, %v1332_v12  ;;  %v2176_v21 = vld [vmem:[%s3313_s9 + $0x68] sm:$0xf0]  ;;  %v3146_v52 = vpop.permute.xlu1 %1467 }
 0x419   : > { %1747 = vmatmul.bf16.gmra.mxu0 %v2159_v26  ;;  %v2215_v26 = vor.u32 %v2290_v46, %v2214_v14  ;;  %v2179_v19 = vor.u32 %v2279_v5, %v2176_v21 }
 0x41a   : > { %1800 = vmatpush.bf16.msra.mxu1 %v1381_v49  ;;  %v3138_v17 = vpop.permute.xlu0 %1462  ;;  %v2222_v49 = vld [vmem:[%s3313_s9 + $0xc0] sm:$0xf] }
 0x41b   : > { %v2223_v20 = vor.u32 %v2292_v8, %v2222_v49 }
 0x41e   : > { %1801 = vmatpush.bf16.msra.mxu1 %v1380_v50  ;;  %v2281_v50 = vld [vmem:[%s3313_s9 + $0x74] sm:$0xf] }
 0x41f   : > { %v2187_v37 = vor.u32 %v2281_v50, %v2184_v60  ;;  %v2289_v60 = vld [vmem:[%s3313_s9 + $0xb4] sm:$0xf] }
 0x420   : > { %v3159_v27 = vpop.permute.xlu1 %1442 }
 0x422   : > { %1802 = vmatpush.bf16.msra.mxu1 %v1379_v30  ;;  %v3148_v6 = vpop.permute.xlu0 %1457  ;;  %v3167_v30 = vpop.permute.xlu2 %1477 }
 0x426   : > { %1803 = vmatpush.bf16.msra.mxu1 %v1378_v7  ;;  %v2294_v7 = vld [vmem:[%s3313_s9 + $0xd4] sm:$0xf0] }
 0x428   : > { %v1438_v12 = vpop.permute.xlu1 %1437 }
 0x429   : > { %1752 = vmatmul.bf16.gmra.mxu0 %v2167_v18  ;;  %v2231_v18 = vor.u32 %v2294_v7, %v2230_v31 }
 0x42a   : > { %1804 = vmatpush.bf16.msra.mxu1 %v1377_v36  ;;  %v2271_v36 = vld [vmem:[%s3313_s9 + $0x24] sm:$0xf]  ;;  %v1433_v9 = vpop.permute.xlu0 %1432  ;;  %v3176_v29 = vpop.permute.xlu2 %1452 }
 0x42b   : > { %v2147_v43 = vor.u32 %v2271_v36, %v2144_v10 }
 0x42e   : > { %1805 = vmatpush.bf16.msra.mxu1 %v3005_v23  ;;  %v2136_v23 = vld [vmem:[%s3313_s9 + $0x18] sm:$0xf0] }
 0x42f   : > { %v2139_v41 = vor.u32 %v2269_v40, %v2136_v23  ;;  %v2195_v23 = vor.u32 %v2283_v38, %v2192_v39 }
 0x431   : > { %2236 = vmatmul.msk.bf16.vlgmr.msra.gmra.mxu1 %vm1676_vm4, %v2131_v35  ;;  %v3178_v35 = vpop.permute.xlu1 %1542 }
 0x432   : > { %v1428_v32 = vpop.permute.xlu0 %1427 }
 0x439   : > { %1757 = vmatmul.bf16.gmra.mxu0 %v2175_v24  ;;  %v1418_v36 = vpop.permute.xlu1 %1417 }
 0x43a   : > { %v1413_v24 = vpop.permute.xlu0 %1412 }
 0x441   : > { %2237 = vmatmul.msk.bf16.gmra.mxu1 %vm1676_vm4, %v2139_v41 }
 0x449   : > { %1762 = vmatmul.bf16.gmra.mxu0 %v2183_v42  ;;  %v1448_v42 = vpop.permute.xlu2 %1447 }
 0x451   : > { %2238 = vmatmul.msk.bf16.gmra.mxu1 %vm1676_vm4, %v2147_v43  ;;  %v1423_v55 = vpop.permute.xlu2 %1422 }
 0x456   : > { %v1728_v1 = vpop.f32.mrf.mxu0 }
 0x457   : > { %v1729_v40 = vadd.f32 %v1728_v1, %v1413_v24 }
 0x459   : > { %1767 = vmatmul.bf16.gmra.mxu0 %v2191_v48 }
 0x45e   : > { %v1730_v22 = vpop.f32.mrf.mxu0 }
 0x45f   : > { %v1731_v10 = vadd.f32 %v1730_v22, %v1418_v36  ;;  %v2208_v22 = vld [vmem:[%s3313_s9 + $0xa8] sm:$0xf0] }
 0x461   : > { %2239 = vmatmul.msk.bf16.gmra.mxu1 %vm1676_vm4, %v2155_v57  ;;  %v2200_v57 = vld [vmem:[%s3313_s9 + $0x98] sm:$0xf0] }
 0x462   : > { %v2203_v59 = vor.u32 %v2285_v53, %v2200_v57 }
 0x466   : > { %v1733_v33 = vpop.f32.mrf.mxu0 }
 0x469   : > { %1772 = vmatmul.bf16.gmra.mxu0 %v2199_v58  ;;  %v1734_v58 = vadd.f32 %v1733_v33, %v1423_v55  ;;  %v3236_v55 = vpop.permute.xlu2 %1547 }
 0x46e   : > { %v1735_v16 = vpop.f32.mrf.mxu0 }
 0x46f   : > { %v1736_v0 = vadd.f32 %v1735_v16, %v1428_v32 }
 0x471   : > { %2240 = vmatmul.msk.bf16.gmra.mxu1 %vm1676_vm4, %v2163_v62 }
 0x476   : > { %v1738_v11 = vpop.f32.mrf.mxu0 }
 0x477   : > { %v1739_v46 = vadd.f32 %v1738_v11, %v1433_v9  ;;  %v2216_v9 = vld [vmem:[%s3313_s9 + $0xb8] sm:$0xf0] }
 0x478   : > { %v2219_v32 = vor.u32 %v2289_v60, %v2216_v9 }
 0x479   : > { %1777 = vmatmul.bf16.gmra.mxu0 %v2207_v13 }
 0x47e   : > { %v1740_v28 = vpop.f32.mrf.mxu0 }
 0x481   : > { %2241 = vmatmul.msk.bf16.gmra.mxu1 %vm1676_vm4, %v2171_v44  ;;  %v2287_v44 = vld [vmem:[%s3313_s9 + $0xa4] sm:$0xf] }
 0x486   : > { %v1743_v34 = vpop.f32.mrf.mxu0 }
 0x489   : > { %1782 = vmatmul.bf16.gmra.mxu0 %v2215_v26  ;;  %v2211_v26 = vor.u32 %v2287_v44, %v2208_v22  ;;  %v1905_v44 = vld [vmem:[%s3315_s11] sm:$0x3] }
 0x48a   : > { %1928 = vst [vmem:[#allocation1] ss:$9 sm:$0xff] %v1905_v44 }
 0x48e   : > { %v1745_v51 = vpop.f32.mrf.mxu0 }
 0x491   : > { %2242 = vmatmul.msk.bf16.gmra.mxu1 %vm1676_vm4, %v2179_v19  ;;  %v1741_v19 = vadd.f32 %v1740_v28, %v1438_v12  ;;  %v1929_v44 = vld [vmem:[#allocation1] sm:$0xff] }
 0x496   : > { %v1748_v63 = vpop.f32.mrf.mxu0 }
 0x499   : > { %1787 = vmatmul.bf16.gmra.mxu0 %v2223_v20 }
 0x49e   : > { %v3204_v33 = vpop.f32.mrf.mxu0 }
 0x4a1   : > { %2243 = vmatmul.msk.bf16.gmra.mxu1 %vm1676_vm4, %v2187_v37  ;;  %v1744_v37 = vadd.f32 %v1743_v34, %v3159_v27 }
 0x4a6   : > { %v1753_v8 = vpop.f32.mrf.mxu0 }
 0x4a9   : > { %1792 = vmatmul.bf16.gmra.mxu0 %v2231_v18  ;;  %v1746_v18 = vadd.f32 %v1745_v51, %v1448_v42 }
 0x4ae   : > { %v1807_v41 = vpop.f32.mrf.mxu1  ;;  %v1755_v7 = vpop.f32.mrf.mxu0 }
 0x4af   : > { %v1808_v25 = vadd.f32 %v1807_v41, %v1729_v40  ;;  %v2291_v40 = vld [vmem:[%s3313_s9 + $0xc4] sm:$0xf] }
 0x4b1   : > { %2244 = vmatmul.msk.bf16.gmra.mxu1 %vm1676_vm4, %v2195_v23  ;;  %v1877_v45 = vmax.f32 %v1808_v25, 0.0  ;;  %v2224_v23 = vld [vmem:[%s3313_s9 + $0xc8] sm:$0xf0]  ;;  %v1749_v25 = vadd.f32 %v1748_v63, %v3176_v29  ;;  %v3240_v63 = vpop.permute.xlu1 %1522 }
 0x4b2   : > { %v2227_v34 = vor.u32 %v2291_v40, %v2224_v23  ;;  %v1538_v40 = vpop.permute.xlu0 %1537 }
 0x4b6   : > { %v1809_v43 = vpop.f32.mrf.mxu1  ;;  %v1758_v41 = vpop.f32.mrf.mxu0 }
 0x4b7   : > { %v1810_v47 = vadd.f32 %v1809_v43, %v1731_v10 }
 0x4b9   : > { %v1878_v48 = vmax.f32 %v1810_v47, 0.0  ;;  %v2293_v47 = vld [vmem:[%s3313_s9 + $0xd4] sm:$0xf] }
 0x4bb   : > { %v3193_v54 = vpack.c.bf16 %v1878_v48, %v1877_v45  ;;  %v2232_v45 = vld [vmem:[%s3313_s9 + $0xd8] sm:$0xf0] }
 0x4bc   : > { %v2235_v48 = vor.u32 %v2293_v47, %v2232_v45 }
 0x4be   : > { %v1812_v61 = vpop.f32.mrf.mxu1  ;;  %v1760_v10 = vpop.f32.mrf.mxu0 }
 0x4bf   : > { %v1813_v62 = vadd.f32 %v1812_v61, %v1734_v58  ;;  %v3238_v61 = vpop.permute.xlu2 %1532  ;;  %v1761_v22 = vadd.f32 %v1760_v10, %v3167_v30 }
 0x4c1   : > { %2245 = vmatmul.msk.bf16.gmra.mxu1 %vm1676_vm4, %v2203_v59  ;;  %v1879_v15 = vmax.f32 %v1813_v62, 0.0 }
 0x4c6   : > { %v1814_v1 = vpop.f32.mrf.mxu1  ;;  %v1763_v53 = vpop.f32.mrf.mxu0 }
 0x4c7   : > { %v1815_v13 = vadd.f32 %v1814_v1, %v1736_v0 }
 0x4c9   : > { %v1880_v3 = vmax.f32 %v1815_v13, 0.0  ;;  %v3242_v13 = vpop.permute.xlu2 %1527 }
 0x4cb   : > { %v3202_v14 = vpack.c.bf16 %v1880_v3, %v1879_v15  ;;  %v3244_v15 = vpop.permute.xlu1 %1517  ;;  %v1764_v3 = vadd.f32 %v1763_v53, %v3157_v56 }
 0x4ce   : > { %v1817_v5 = vpop.f32.mrf.mxu1  ;;  %v1765_v57 = vpop.f32.mrf.mxu0 }
 0x4cf   : > { %v1818_v21 = vadd.f32 %v1817_v5, %v1739_v46  ;;  %v1766_v46 = vadd.f32 %v1765_v57, %v3121_v2  ;;  %v1751_v2 = vadd.f32 %v3204_v33, %v3148_v6 }
 0x4d1   : > { %2246 = vmatmul.msk.bf16.gmra.mxu1 %vm1676_vm4, %v2211_v26  ;;  %v1881_v20 = vmax.f32 %v1818_v21, 0.0  ;;  %v1759_v21 = vadd.f32 %v1758_v41, %v3130_v4  ;;  %v1503_v9 = vpop.permute.xlu2 %1502 }
 0x4d6   : > { %v1819_v16 = vpop.f32.mrf.mxu1  ;;  %v1768_v59 = vpop.f32.mrf.mxu0 }
 0x4d7   : > { %v1820_v49 = vadd.f32 %v1819_v16, %v1741_v19 }
 0x4d9   : > { %v1882_v50 = vmax.f32 %v1820_v49, 0.0 }
 0x4db   : > { %v3213_v11 = vpack.c.bf16 %v1882_v50, %v1881_v20  ;;  %v1756_v20 = vadd.f32 %v1755_v7, %v3146_v52 }
 0x4de   : > { %v1822_v31 = vpop.f32.mrf.mxu1  ;;  %v1770_v0 = vpop.f32.mrf.mxu0 }
 0x4df   : > { %v1823_v12 = vadd.f32 %v1822_v31, %v1744_v37  ;;  %v1754_v37 = vadd.f32 %v1753_v8, %v3138_v17 }
 0x4e1   : > { %2247 = vmatmul.msk.bf16.gmra.mxu1 %vm1676_vm4, %v2219_v32  ;;  %v1883_v39 = vmax.f32 %v1823_v12, 0.0  ;;  %v1493_v12 = vpop.permute.xlu1 %1492 }
 0x4e6   : > { %v1824_v28 = vpop.f32.mrf.mxu1  ;;  %v1773_v49 = vpop.f32.mrf.mxu0 }
 0x4e7   : > { %v1825_v38 = vadd.f32 %v1824_v28, %v1746_v18  ;;  %v1769_v18 = vadd.f32 %v1768_v59, %v1493_v12  ;;  %v1774_v53 = vadd.f32 %v1773_v49, %v1503_v9 }
 0x4e9   : > { %v1884_v24 = vmax.f32 %v1825_v38, 0.0 }
 0x4eb   : > { %v3223_v27 = vpack.c.bf16 %v1884_v24, %v1883_v39 }
 0x4ee   : > { %v1827_v36 = vpop.f32.mrf.mxu1  ;;  %v1775_v17 = vpop.f32.mrf.mxu0 }
 0x4ef   : > { %v3226_v42 = vadd.f32 %v1827_v36, %v1749_v25  ;;  %v1498_v25 = vpop.permute.xlu2 %1497 }
 0x4f1   : > { %2248 = vmatmul.msk.bf16.gmra.mxu1 %vm1676_vm4, %v2227_v34  ;;  %v1771_v34 = vadd.f32 %v1770_v0, %v1498_v25  ;;  %v1885_v36 = vmax.f32 %v3226_v42, 0.0 }
 0x4f6   : > { %v1829_v43 = vpop.f32.mrf.mxu1 }
 0x4f7   : > { %v1830_v39 = vadd.f32 %v1829_v43, %v1751_v2  ;;  %v1513_v43 = vpop.permute.xlu0 %1512 }
 0x4f9   : > { %v1886_v8 = vmax.f32 %v1830_v39, 0.0 }
 0x4fb   : > { %v1910_v33 = vpack.c.bf16 %v1886_v8, %v1885_v36 }
 0x4fe   : > { %v1832_v51 = vpop.f32.mrf.mxu1 }
 0x4ff   : > { %v1833_v4 = vadd.f32 %v1832_v51, %v1754_v37  ;;  %v1778_v51 = vpop.f32.mrf.mxu0 }
 0x501   : > { %2249 = vmatmul.msk.bf16.gmra.mxu1 %vm1676_vm4, %v2235_v48  ;;  %v1887_v23 = vmax.f32 %v1833_v4, 0.0 }
 0x506   : > { %v1834_v29 = vpop.f32.mrf.mxu1 }
 0x507   : > { %v1835_v32 = vadd.f32 %v1834_v29, %v1756_v20  ;;  %v1780_v59 = vpop.f32.mrf.mxu0 }
 0x509   : > { %v1888_v52 = vmax.f32 %v1835_v32, 0.0 }
 0x50b   : > { %v1911_v41 = vpack.c.bf16 %v1888_v52, %v1887_v23 }
 0x50e   : > { %v1837_v58 = vpop.f32.mrf.mxu1 }
 0x50f   : > { %v1838_v50 = vadd.f32 %v1837_v58, %v1759_v21  ;;  %v1508_v58 = vpop.permute.xlu0 %1507 }
 0x510   : > { %v1776_v42 = vadd.f32 %v1775_v17, %v1508_v58 }
 0x511   : > { %v1889_v28 = vmax.f32 %v1838_v50, 0.0 }
 0x516   : > { %v1839_v62 = vpop.f32.mrf.mxu1 }
 0x517   : > { %v1840_v19 = vadd.f32 %v1839_v62, %v1761_v22 }
 0x519   : > { %v1890_v31 = vmax.f32 %v1840_v19, 0.0 }
 0x51b   : > { %v1912_v7 = vpack.c.bf16 %v1890_v31, %v1889_v28 }
 0x51e   : > { %v1842_v1 = vpop.f32.mrf.mxu1 }
 0x51f   : > { %v1843_v26 = vadd.f32 %v1842_v1, %v1764_v3 }
 0x521   : > { %v1891_v56 = vmax.f32 %v1843_v26, 0.0 }
 0x526   : > { %v1844_v5 = vpop.f32.mrf.mxu1 }
 0x527   : > { %v1845_v16 = vadd.f32 %v1844_v5, %v1766_v46  ;;  %v1779_v46 = vadd.f32 %v1778_v51, %v1513_v43  ;;  %v1783_v5 = vpop.f32.mrf.mxu0 }
 0x528   : > { %v1784_v52 = vadd.f32 %v1783_v5, %v3240_v63  ;;  %v1930_v63 = vld [vmem:[#allocation1 + $0x9] sm:$0xff] }
 0x529   : > { %v1892_v60 = vmax.f32 %v1845_v16, 0.0 }
 0x52b   : > { %v1913_v30 = vpack.c.bf16 %v1892_v60, %v1891_v56 }
 0x52d   : > { %1934 = vmatpush.bf16.msra.mxu2 %v1913_v30 }
 0x52e   : > { %v1847_v38 = vpop.f32.mrf.mxu1 }
 0x52f   : > { %v1848_v24 = vadd.f32 %v1847_v38, %v1769_v18 }
 0x531   : > { %1935 = vmatpush.bf16.msra.mxu2 %v1912_v7  ;;  %v1893_v47 = vmax.f32 %v1848_v24, 0.0 }
 0x535   : > { %1936 = vmatpush.bf16.msra.mxu2 %v1911_v41 }
 0x536   : > { %v1849_v6 = vpop.f32.mrf.mxu1 }
 0x537   : > { %v1850_v10 = vadd.f32 %v1849_v6, %v1771_v34 }
 0x539   : > { %v1894_v45 = vmax.f32 %v1850_v10, 0.0  ;;  %1937 = vmatpush.bf16.msra.mxu2 %v1910_v33  ;;  %v1924_v33 = vpop.permute.xlu0 %1923 }
 0x53a   : > { %v1926_v10 = vperm.slane %v1924_v33, 0 }
 0x53b   : > { %v3258_v48 = vpack.c.bf16 %v1894_v45, %v1893_v47 }
 0x53d   : > { %1938 = vmatpush.bf16.msra.mxu2 %v3223_v27 }
 0x53e   : > { %v1852_v29 = vpop.f32.mrf.mxu1 }
 0x53f   : > { %v1853_v57 = vadd.f32 %v1852_v29, %v1774_v53 }
 0x541   : > { %1939 = vmatpush.bf16.msra.mxu2 %v3213_v11  ;;  %v1895_v1 = vmax.f32 %v1853_v57, 0.0  ;;  %v1785_v11 = vpop.f32.mrf.mxu0 }
 0x542   : > { %v1786_v4 = vadd.f32 %v1785_v11, %v3242_v13 }
 0x545   : > { %1940 = vmatpush.bf16.msra.mxu2 %v3202_v14 }
 0x546   : > { %v1854_v62 = vpop.f32.mrf.mxu1 }
 0x547   : > { %v1855_v0 = vadd.f32 %v1854_v62, %v1776_v42 }
 0x549   : > { %v1896_v3 = vmax.f32 %v1855_v0, 0.0  ;;  %1941 = vmatpush.bf16.msra.mxu2 %v3193_v54  ;;  %v1788_v16 = vpop.f32.mrf.mxu0 }
 0x54a   : > { %v1789_v12 = vadd.f32 %v1788_v16, %v3238_v61 }
 0x54b   : > { %v1915_v22 = vpack.c.bf16 %v1896_v3, %v1895_v1 }
 0x54c   : > { %1942 = vmatmul.bf16.vlgmr.msra.gmra.mxu2 %v1929_v44 }
 0x54e   : > { %v1857_v27 = vpop.f32.mrf.mxu1 }
 0x54f   : > { %v1858_v26 = vadd.f32 %v1857_v27, %v1779_v46 }
 0x551   : > { %v1790_v14 = vpop.f32.mrf.mxu0  ;;  %v1897_v34 = vmax.f32 %v1858_v26, 0.0 }
 0x552   : > { %v1791_v37 = vadd.f32 %v1790_v14, %v1538_v40 }
 0x556   : > { %v1859_v21 = vpop.f32.mrf.mxu1 }
 0x559   : > { %v1793_v56 = vpop.f32.mrf.mxu0 }
 0x55a   : > { %v1794_v54 = vadd.f32 %v1793_v56, %v3178_v35  ;;  %v1781_v35 = vadd.f32 %v1780_v59, %v3244_v15 }
 0x55c   : > { %v1860_v17 = vadd.f32 %v1859_v21, %v1781_v35 }
 0x55e   : > { %v1862_v19 = vpop.f32.mrf.mxu1  ;;  %v1898_v25 = vmax.f32 %v1860_v17, 0.0 }
 0x55f   : > { %v1863_v40 = vadd.f32 %v1862_v19, %v1784_v52 }
 0x560   : > { %v1916_v36 = vpack.c.bf16 %v1898_v25, %v1897_v34 }
 0x561   : > { %v1795_v9 = vpop.f32.mrf.mxu0  ;;  %v1899_v41 = vmax.f32 %v1863_v40, 0.0 }
 0x562   : > { %v1796_v32 = vadd.f32 %v1795_v9, %v3236_v55 }
 0x566   : > { %v1864_v49 = vpop.f32.mrf.mxu1 }
 0x567   : > { %v1865_v7 = vadd.f32 %v1864_v49, %v1786_v4 }
 0x569   : > { %v1900_v8 = vmax.f32 %v1865_v7, 0.0 }
 0x56b   : > { %v1917_v13 = vpack.c.bf16 %v1900_v8, %v1899_v41 }
 0x56e   : > { %v1867_v20 = vpop.f32.mrf.mxu1 }
 0x56f   : > { %v1868_v28 = vadd.f32 %v1867_v20, %v1789_v12 }
 0x571   : > { %v1901_v55 = vmax.f32 %v1868_v28, 0.0 }
 0x576   : > { %v1869_v50 = vpop.f32.mrf.mxu1 }
 0x577   : > { %v1870_v2 = vadd.f32 %v1869_v50, %v1791_v37 }
 0x579   : > { %v1902_v24 = vmax.f32 %v1870_v2, 0.0 }
 0x57b   : > { %v1918_v61 = vpack.c.bf16 %v1902_v24, %v1901_v55 }
 0x57e   : > { %v1872_v60 = vpop.f32.mrf.mxu1 }
 0x57f   : > { %v1873_v31 = vadd.f32 %v1872_v60, %v1794_v54 }
 0x581   : > { %v1903_v38 = vmax.f32 %v1873_v31, 0.0 }
 0x586   : > { %v1874_v30 = vpop.f32.mrf.mxu1 }
 0x587   : > { %v1875_v18 = vadd.f32 %v1874_v30, %v1796_v32 }
 0x589   : > { %v1904_v39 = vmax.f32 %v1875_v18, 0.0 }
 0x58b   : > { %v1919_v23 = vpack.c.bf16 %v1904_v39, %v1903_v38 }
 0x58d   : > { %1949 = vmatpush.bf16.msrb.mxu2 %v1919_v23 }
 0x591   : > { %1950 = vmatpush.bf16.msrb.mxu2 %v1918_v61 }
 0x595   : > { %1951 = vmatpush.bf16.msrb.mxu2 %v1917_v13 }
 0x599   : > { %1952 = vmatpush.bf16.msrb.mxu2 %v1916_v36 }
 0x59d   : > { %1953 = vmatpush.bf16.msrb.mxu2 %v1915_v22 }
 0x5a1   : > { %1954 = vmatpush.bf16.msrb.mxu2 %v3258_v48 }
 0x5a4   : > { %2250 = vmatmul.msk.bf16.vlgmr.msrb.gmra.mxu2 %vm1676_vm4, %v1930_v63 }
 0x5cf   : > { %v1943_v15 = vpop.f32.mrf.mxu2 }
 0x5d0   : > { %v1944_v47 = vadd.f32 %v1943_v15, %v1926_v10 }
 0x5d7   : > { %v1945_v6 = vpop.f32.mrf.mxu2 }
 0x627   : > { %v1956_v45 = vpop.f32.mrf.mxu2 }
 0x628   : > { %v1957_v43 = vadd.f32 %v1956_v45, %v1944_v47 }
 0x62a   : > { %v1960_v51 = vsub.f32 0.0, %v1957_v43 }
 0x62c   : > { %v1961_v53 = vmul.f32 1.442695, %v1960_v51 }
 0x62e   : > { %2338 = vpow2.f32 %v1961_v53 }
 0x62f   : > { %v1958_v29 = vpop.f32.mrf.mxu2 }
 0x634   : > { %v2339_v57 = vpop.eup %2338 }
 0x635   : > { %v1963_v58 = vadd.f32 1.0, %v2339_v57 }
 0x637   : > { %2340 = vrcp.f32 %v1963_v58 }
 0x63d   : > { %v2341_v48 = vpop.eup %2340 }
 0x63e   : > { %1965 = vst [vmem:[%s432_s18] sm:$0x1] %v2341_v48 }
 0x63f   : > { %2369 = shalt.err (!%p2366_p3)
}
 0x640   : > { %2295 = dma.vmem_to_hbm [thread:$0]  (%p2518_p5), %s1978_s23, 16, %s1980_s24, %s1967_s25  }
 0x641 PF: > { %p2301_p4 = scmp.ge.s32.totalorder %s2404_s30, 2  ;;  %s1991_s17 = sand.u32 1, %s2392_s27  }
 0x642   : > { %s1992_s0 = scalar_lea.sflag [#allocation4], %s1991_s17 }
 0x643   : > { %p2298_p7 = pnand %p2301_p4, %p2522_p6 }
 0x645   : > { %p2299_p8 = pneg %p2298_p7 }
 0x647   : > { %2387 = dma.done.wait (%p2299_p8), %s1992_s0, 16  }
 0x648   : > { %2389 = vsyncadd (%p2299_p8), %s1992_s0, 4294967280  ;;  %s3325_s29 = sld [smem:[#allocation6_spill]]  ;;  %p25_p9 = scmp.ge.s32.totalorder %s2505_s15, 4  }
 0x649   : > { %s3326_s18 = sld [smem:[#allocation7_spill]]  ;;  %s3327_s27 = smov %s2396_s28 }
 0x64a   : > { %s3330_s30 = smov %s2505_s15 }
 0x64b   :  { %27 = sbr.rel (!%p25_p9) target bundleno = 6 (0x6), region = 107 }
 0x64e   : > { %s3328_s28 = smov %s3325_s29 }
 0x64f   : > { %s3329_s29 = smov %s3326_s18 }
 0x650   :  { %1997 = vsyncpa [#allocation4], 1 }
 0x651   :  { %1999 = vsyncpa [#allocation4 + $0x1], 1 }

</bundles_post_ra>
